<compile_context>
chip_gen: v5e
topology: v5e:2x2
jax: 0.10.0
libtpu: 0.0.40
codegen_flags: <defaults>
</compile_context>

<pallas_src>
import functools

import jax
import jax.numpy as jnp
from jax.experimental import pallas as pl
from jax.experimental.pallas import tpu as pltpu


_PAD = 128  # lane-tile-aligned zero extension on each side of the flattened spatial axis


def _encoder1_fused_kernel(x_ref, w1_ref, b1_ref, w2_ref, b2_ref, o_ref,
                           *, H, W, C0, C1, C2, BT):
    """relu(conv2(relu(conv1(x)))) for BT images, all channel-major (C, H*W).

    x_ref : (BT, C0, H*W)   NCHW input with spatial flattened (free wrapper reshape)
    w1_ref: (9, C1, C0)     conv1 weights, tap t = dy*3 + dx, each (out, in)
    b1_ref: (C1, 1)
    w2_ref: (3, C2, 3*C1)   conv2 weights, dy-major; columns ordered dx*C1 + ci
    b2_ref: (C2, 1)
    o_ref : (BT, C2, H*W)   channel-major output (lane-dense stores)
    """
    f32 = jnp.float32
    HW = H * W

    # Column-wrap masks: only the dx = -1 / +1 taps need them.  Vertical out-of-range
    # reads fall into the zero extension blocks and are zero "for free".
    j = jax.lax.broadcasted_iota(jnp.int32, (1, HW), 1) % W
    m_left = (j > 0).astype(f32)        # kills j-1 reads that wrapped to the previous row
    m_right = (j < W - 1).astype(f32)   # kills j+1 reads that wrapped to the next row
    col_mask = (m_left, None, m_right)  # indexed by dx

    b1 = b1_ref[...]                    # (C1, 1)
    b2 = b2_ref[...]                    # (C2, 1)
    zpad0 = jnp.zeros((C0, _PAD), f32)
    zpad1 = jnp.zeros((C1, _PAD), f32)

    for b in range(BT):
        # ---- layer 1: conv3x3(C0 -> C1) + bias + ReLU ---------------------------
        x = x_ref[b].astype(f32)                                    # (C0, HW)
        xe = jnp.concatenate([zpad0, x, zpad0], axis=1)             # (C0, HW + 2*_PAD)

        acc1 = jnp.zeros((C1, HW), f32)
        for t in range(9):                                          # 9 tiny K=C0 matmuls
            dy, dx = t // 3, t % 3
            start = _PAD + (dy - 1) * W + (dx - 1)
            tap = xe[:, start:start + HW]                           # (C0, HW) static slice
            if col_mask[dx] is not None:
                tap = tap * col_mask[dx]
            acc1 = acc1 + jnp.dot(w1_ref[t], tap, preferred_element_type=f32)
        y1 = jnp.maximum(acc1 + b1, 0.0)                            # (C1, HW), stays in regs/VMEM

        # ---- layer 2: conv3x3(C1 -> C2) + bias + ReLU, dx-folded (K = 3*C1) -----
        ye = jnp.concatenate([zpad1, y1, zpad1], axis=1)            # (C1, HW + 2*_PAD)
        acc2 = jnp.zeros((C2, HW), f32)
        for dy in range(3):
            taps = []
            for dx in range(3):
                start = _PAD + (dy - 1) * W + (dx - 1)
                tap = ye[:, start:start + HW]                       # (C1, HW)
                if col_mask[dx] is not None:
                    tap = tap * col_mask[dx]
                taps.append(tap)
            rhs = jnp.concatenate(taps, axis=0)                     # (3*C1, HW), 8-aligned concat
            acc2 = acc2 + jnp.dot(w2_ref[dy], rhs, preferred_element_type=f32)
        y2 = jnp.maximum(acc2 + b2, 0.0)                            # (C2, HW)

        o_ref[b] = y2.astype(o_ref.dtype)                           # 256-lane dense store


def encoder1_forward(x_nchw, params):
    """Forward of Encoder1: relu(conv2(relu(conv1(x)))).  x_nchw: (N, 3, H, W) NCHW."""
    w1, b1, w2, b2 = params                      # HWIO weights, (Cout,) biases
    N, C0, H, W = x_nchw.shape
    C1 = w1.shape[-1]
    C2 = w2.shape[-1]
    HW = H * W

    # Free, contiguous reshape only -- no HBM transpose ops around the kernel.
    x_flat = x_nchw.reshape(N, C0, HW)

    # conv1: per-tap (Cout, Cin) matrices, tap index t = dy*3 + dx.
    w1t = jnp.transpose(w1.reshape(9, C0, C1), (0, 2, 1))            # (9, C1, C0)
    # conv2: dy-folded (Cout, 3*Cin) blocks with column order dx*C1 + ci.
    w2t = jnp.transpose(w2, (0, 3, 1, 2)).reshape(3, C2, 3 * C1)     # (3, C2, 3*C1)
    b1c = b1.reshape(C1, 1)
    b2c = b2.reshape(C2, 1)

    # Images per grid step: amortize per-step pipeline overhead, but keep >= 2 grid
    # steps so the "parallel" batch axis can feed both TensorCores on v7x.
    BT = 1
    for cand in (8, 4, 2):
        if N % cand == 0 and N // cand >= 2:
            BT = cand
            break

    kernel = functools.partial(_encoder1_fused_kernel,
                               H=H, W=W, C0=C0, C1=C1, C2=C2, BT=BT)

    out = pl.pallas_call(
        kernel,
        out_shape=jax.ShapeDtypeStruct((N, C2, HW), jnp.float32),
        grid_spec=pltpu.PrefetchScalarGridSpec(
            num_scalar_prefetch=0,
            grid=(N // BT,),
            in_specs=[
                pl.BlockSpec((BT, C0, HW), lambda n: (n, 0, 0)),
                pl.BlockSpec((9, C1, C0), lambda n: (0, 0, 0)),
                pl.BlockSpec((C1, 1), lambda n: (0, 0)),
                pl.BlockSpec((3, C2, 3 * C1), lambda n: (0, 0, 0)),
                pl.BlockSpec((C2, 1), lambda n: (0, 0)),
            ],
            out_specs=pl.BlockSpec((BT, C2, HW), lambda n: (n, 0, 0)),
        ),
        compiler_params=pltpu.CompilerParams(
            dimension_semantics=("parallel",)),
    )(x_flat, w1t, b1c, w2t, b2c)

    return out.reshape(N, C2, H, W)              # free reshape, already NCHW


def init_params(key):
    """Deterministic synthetic init (fan-in scaled normal), HWIO weight layout."""
    k1, k2, k3, k4 = jax.random.split(key, 4)
    w1 = jax.random.normal(k1, (3, 3, 3, 32), jnp.float32) * (1.0 / jnp.sqrt(3 * 9))
    b1 = jax.random.normal(k2, (32,), jnp.float32) * 0.01
    w2 = jax.random.normal(k3, (3, 3, 32, 64), jnp.float32) * (1.0 / jnp.sqrt(32 * 9))
    b2 = jax.random.normal(k4, (64,), jnp.float32) * 0.01
    return (w1, b1, w2, b2)


def _reference_forward(x_nchw, params):
    """Pure-JAX reference (lax conv) for a correctness sanity check."""
    w1, b1, w2, b2 = params
    dn = jax.lax.conv_dimension_numbers(x_nchw.shape, w1.shape, ("NCHW", "HWIO", "NCHW"))
    y = jax.lax.conv_general_dilated(x_nchw, w1, (1, 1), "SAME", dimension_numbers=dn)
    y = jax.nn.relu(y + b1[None, :, None, None])
    dn2 = jax.lax.conv_dimension_numbers(y.shape, w2.shape, ("NCHW", "HWIO", "NCHW"))
    y = jax.lax.conv_general_dilated(y, w2, (1, 1), "SAME", dimension_numbers=dn2)
    y = jax.nn.relu(y + b2[None, :, None, None])
    return y


if __name__ == "__main__":
    key = jax.random.PRNGKey(0)
    kx, kp = jax.random.split(key)
    # Small shapes consistent with the module: batch=2, in_channels=3, spatial=16.
    x = jax.random.normal(kx, (2, 3, 16, 16), jnp.float32)
    params = init_params(kp)

    out = jax.block_until_ready(encoder1_forward(x, params))
    assert out.shape == (2, 64, 16, 16), out.shape

    ref = jax.block_until_ready(_reference_forward(x, params))
    max_err = float(jnp.max(jnp.abs(out - ref)))
    # Tolerance leaves headroom for MXU / XLA-conv default matmul precision differences.
    assert jnp.allclose(out, ref, atol=2e-2, rtol=2e-2), max_err

    print("KERNEL_OK")
</pallas_src>

<mosaic_0001>
module attributes {stable_mosaic.version = 11 : i64} {
  func.func @_encoder1_fused_kernel(%arg0: i32, %arg1: memref<1x3x256xf32, #tpu.memory_space<vmem>>, %arg2: memref<9x32x3xf32, #tpu.memory_space<vmem>>, %arg3: memref<32x1xf32, #tpu.memory_space<vmem>>, %arg4: memref<3x64x96xf32, #tpu.memory_space<vmem>>, %arg5: memref<64x1xf32, #tpu.memory_space<vmem>>, %arg6: memref<1x64x256xf32, #tpu.memory_space<vmem>>) attributes {dimension_semantics = [#tpu.dimension_semantics<parallel>], iteration_bounds = array<i64: 2>, scalar_prefetch = 0 : i64, scratch_operands = 0 : i64, tpu.core_type = #tpu.core_type<tc>, window_params = [{transform_indices = @transform_0, window_bounds = array<i64: 1, 3, 256>}, {pipeline_mode = #tpu.pipeline_mode<synchronous>, transform_indices = @transform_1, window_bounds = array<i64: 9, 32, 3>}, {pipeline_mode = #tpu.pipeline_mode<synchronous>, transform_indices = @transform_2, window_bounds = array<i64: 32, 1>}, {pipeline_mode = #tpu.pipeline_mode<synchronous>, transform_indices = @transform_3, window_bounds = array<i64: 3, 64, 96>}, {pipeline_mode = #tpu.pipeline_mode<synchronous>, transform_indices = @transform_4, window_bounds = array<i64: 64, 1>}, {transform_indices = @transform_5, window_bounds = array<i64: 1, 64, 256>}]} {
    %0 = tpu.iota {dimensions = array<i32: 1>} : vector<1x256xi32>
    %c16_i32 = arith.constant 16 : i32
    %c0_i32 = arith.constant 0 : i32
    %1 = arith.cmpi eq, %c16_i32, %c0_i32 : i32
    %c1_i32 = arith.constant 1 : i32
    %2 = arith.select %1, %c1_i32, %c16_i32 : i32
    %3 = vector.broadcast %2 : i32 to vector<1x256xi32>
    %4 = arith.remsi %0, %3 : vector<1x256xi32>
    %c0_i32_0 = arith.constant 0 : i32
    %5 = vector.broadcast %c0_i32_0 : i32 to vector<1x256xi32>
    %6 = arith.cmpi ne, %4, %5 : vector<1x256xi32>
    %c0_i32_1 = arith.constant 0 : i32
    %7 = vector.broadcast %c0_i32_1 : i32 to vector<1x256xi32>
    %8 = arith.cmpi slt, %4, %7 : vector<1x256xi32>
    %c0_i32_2 = arith.constant 0 : i32
    %9 = arith.cmpi slt, %2, %c0_i32_2 : i32
    %10 = vector.broadcast %9 : i1 to vector<1x256xi1>
    %11 = vector.broadcast %10 : vector<1x256xi1> to vector<1x256xi1>
    %12 = arith.xori %8, %11 : vector<1x256xi1>
    %13 = arith.andi %12, %6 : vector<1x256xi1>
    %14 = vector.broadcast %2 : i32 to vector<1x256xi32>
    %15 = arith.addi %4, %14 : vector<1x256xi32>
    %16 = arith.select %13, %15, %4 : vector<1x256xi1>, vector<1x256xi32>
    %c0_i32_3 = arith.constant 0 : i32
    %17 = vector.broadcast %c0_i32_3 : i32 to vector<1x256xi32>
    %18 = arith.cmpi sgt, %16, %17 : vector<1x256xi32>
    %19 = arith.extui %18 : vector<1x256xi1> to vector<1x256xi32>
    %20 = arith.sitofp %19 : vector<1x256xi32> to vector<1x256xf32>
    %c15_i32 = arith.constant 15 : i32
    %21 = vector.broadcast %c15_i32 : i32 to vector<1x256xi32>
    %22 = arith.cmpi slt, %16, %21 : vector<1x256xi32>
    %23 = arith.extui %22 : vector<1x256xi1> to vector<1x256xi32>
    %24 = arith.sitofp %23 : vector<1x256xi32> to vector<1x256xf32>
    %c0 = arith.constant 0 : index
    %c0_4 = arith.constant 0 : index
    %25 = vector.load %arg3[%c0, %c0_4] : memref<32x1xf32, #tpu.memory_space<vmem>>, vector<32x1xf32>
    %c0_5 = arith.constant 0 : index
    %c0_6 = arith.constant 0 : index
    %26 = vector.load %arg5[%c0_5, %c0_6] : memref<64x1xf32, #tpu.memory_space<vmem>>, vector<64x1xf32>
    %cst = arith.constant 0.000000e+00 : f32
    %27 = vector.broadcast %cst : f32 to vector<3x128xf32>
    %cst_7 = arith.constant 0.000000e+00 : f32
    %28 = vector.broadcast %cst_7 : f32 to vector<32x128xf32>
    %c0_8 = arith.constant 0 : index
    %c0_9 = arith.constant 0 : index
    %c0_10 = arith.constant 0 : index
    %29 = vector.load %arg1[%c0_8, %c0_9, %c0_10] : memref<1x3x256xf32, #tpu.memory_space<vmem>>, vector<1x3x256xf32>
    %30 = vector.shape_cast %29 : vector<1x3x256xf32> to vector<3x256xf32>
    %31 = tpu.concatenate %27, %30, %27 in 1 : vector<3x128xf32>, vector<3x256xf32>, vector<3x128xf32> -> vector<3x512xf32>
    %cst_11 = arith.constant 0.000000e+00 : f32
    %32 = vector.broadcast %cst_11 : f32 to vector<32x256xf32>
    %33 = vector.extract_strided_slice %31 {offsets = [0, 111], sizes = [3, 256], strides = [1, 1]} : vector<3x512xf32> to vector<3x256xf32>
    %34 = vector.broadcast %20 : vector<1x256xf32> to vector<3x256xf32>
    %35 = arith.mulf %33, %34 : vector<3x256xf32>
    %c0_12 = arith.constant 0 : index
    %c0_13 = arith.constant 0 : index
    %c0_14 = arith.constant 0 : index
    %36 = vector.load %arg2[%c0_12, %c0_13, %c0_14] : memref<9x32x3xf32, #tpu.memory_space<vmem>>, vector<1x32x3xf32>
    %37 = vector.shape_cast %36 : vector<1x32x3xf32> to vector<32x3xf32>
    %cst_15 = arith.constant dense<0.000000e+00> : vector<32x256xf32>
    %38 = tpu.matmul %37, %35, %cst_15 {dimension_numbers = #tpu.dot_dimension_numbers<[1], [0], [0], [1], [0, 0, 1, 1], [], []>} : vector<32x3xf32>, vector<3x256xf32>, vector<32x256xf32> -> vector<32x256xf32>
    %39 = arith.addf %32, %38 : vector<32x256xf32>
    %40 = vector.extract_strided_slice %31 {offsets = [0, 112], sizes = [3, 256], strides = [1, 1]} : vector<3x512xf32> to vector<3x256xf32>
    %c1 = arith.constant 1 : index
    %c0_16 = arith.constant 0 : index
    %c0_17 = arith.constant 0 : index
    %41 = vector.load %arg2[%c1, %c0_16, %c0_17] : memref<9x32x3xf32, #tpu.memory_space<vmem>>, vector<1x32x3xf32>
    %42 = vector.shape_cast %41 : vector<1x32x3xf32> to vector<32x3xf32>
    %cst_18 = arith.constant dense<0.000000e+00> : vector<32x256xf32>
    %43 = tpu.matmul %42, %40, %cst_18 {dimension_numbers = #tpu.dot_dimension_numbers<[1], [0], [0], [1], [0, 0, 1, 1], [], []>} : vector<32x3xf32>, vector<3x256xf32>, vector<32x256xf32> -> vector<32x256xf32>
    %44 = arith.addf %39, %43 : vector<32x256xf32>
    %45 = vector.extract_strided_slice %31 {offsets = [0, 113], sizes = [3, 256], strides = [1, 1]} : vector<3x512xf32> to vector<3x256xf32>
    %46 = vector.broadcast %24 : vector<1x256xf32> to vector<3x256xf32>
    %47 = arith.mulf %45, %46 : vector<3x256xf32>
    %c2 = arith.constant 2 : index
    %c0_19 = arith.constant 0 : index
    %c0_20 = arith.constant 0 : index
    %48 = vector.load %arg2[%c2, %c0_19, %c0_20] : memref<9x32x3xf32, #tpu.memory_space<vmem>>, vector<1x32x3xf32>
    %49 = vector.shape_cast %48 : vector<1x32x3xf32> to vector<32x3xf32>
    %cst_21 = arith.constant dense<0.000000e+00> : vector<32x256xf32>
    %50 = tpu.matmul %49, %47, %cst_21 {dimension_numbers = #tpu.dot_dimension_numbers<[1], [0], [0], [1], [0, 0, 1, 1], [], []>} : vector<32x3xf32>, vector<3x256xf32>, vector<32x256xf32> -> vector<32x256xf32>
    %51 = arith.addf %44, %50 : vector<32x256xf32>
    %52 = vector.extract_strided_slice %31 {offsets = [0, 127], sizes = [3, 256], strides = [1, 1]} : vector<3x512xf32> to vector<3x256xf32>
    %53 = vector.broadcast %20 : vector<1x256xf32> to vector<3x256xf32>
    %54 = arith.mulf %52, %53 : vector<3x256xf32>
    %c3 = arith.constant 3 : index
    %c0_22 = arith.constant 0 : index
    %c0_23 = arith.constant 0 : index
    %55 = vector.load %arg2[%c3, %c0_22, %c0_23] : memref<9x32x3xf32, #tpu.memory_space<vmem>>, vector<1x32x3xf32>
    %56 = vector.shape_cast %55 : vector<1x32x3xf32> to vector<32x3xf32>
    %cst_24 = arith.constant dense<0.000000e+00> : vector<32x256xf32>
    %57 = tpu.matmul %56, %54, %cst_24 {dimension_numbers = #tpu.dot_dimension_numbers<[1], [0], [0], [1], [0, 0, 1, 1], [], []>} : vector<32x3xf32>, vector<3x256xf32>, vector<32x256xf32> -> vector<32x256xf32>
    %58 = arith.addf %51, %57 : vector<32x256xf32>
    %59 = vector.extract_strided_slice %31 {offsets = [0, 128], sizes = [3, 256], strides = [1, 1]} : vector<3x512xf32> to vector<3x256xf32>
    %c4 = arith.constant 4 : index
    %c0_25 = arith.constant 0 : index
    %c0_26 = arith.constant 0 : index
    %60 = vector.load %arg2[%c4, %c0_25, %c0_26] : memref<9x32x3xf32, #tpu.memory_space<vmem>>, vector<1x32x3xf32>
    %61 = vector.shape_cast %60 : vector<1x32x3xf32> to vector<32x3xf32>
    %cst_27 = arith.constant dense<0.000000e+00> : vector<32x256xf32>
    %62 = tpu.matmul %61, %59, %cst_27 {dimension_numbers = #tpu.dot_dimension_numbers<[1], [0], [0], [1], [0, 0, 1, 1], [], []>} : vector<32x3xf32>, vector<3x256xf32>, vector<32x256xf32> -> vector<32x256xf32>
    %63 = arith.addf %58, %62 : vector<32x256xf32>
    %64 = vector.extract_strided_slice %31 {offsets = [0, 129], sizes = [3, 256], strides = [1, 1]} : vector<3x512xf32> to vector<3x256xf32>
    %65 = vector.broadcast %24 : vector<1x256xf32> to vector<3x256xf32>
    %66 = arith.mulf %64, %65 : vector<3x256xf32>
    %c5 = arith.constant 5 : index
    %c0_28 = arith.constant 0 : index
    %c0_29 = arith.constant 0 : index
    %67 = vector.load %arg2[%c5, %c0_28, %c0_29] : memref<9x32x3xf32, #tpu.memory_space<vmem>>, vector<1x32x3xf32>
    %68 = vector.shape_cast %67 : vector<1x32x3xf32> to vector<32x3xf32>
    %cst_30 = arith.constant dense<0.000000e+00> : vector<32x256xf32>
    %69 = tpu.matmul %68, %66, %cst_30 {dimension_numbers = #tpu.dot_dimension_numbers<[1], [0], [0], [1], [0, 0, 1, 1], [], []>} : vector<32x3xf32>, vector<3x256xf32>, vector<32x256xf32> -> vector<32x256xf32>
    %70 = arith.addf %63, %69 : vector<32x256xf32>
    %71 = vector.extract_strided_slice %31 {offsets = [0, 143], sizes = [3, 256], strides = [1, 1]} : vector<3x512xf32> to vector<3x256xf32>
    %72 = vector.broadcast %20 : vector<1x256xf32> to vector<3x256xf32>
    %73 = arith.mulf %71, %72 : vector<3x256xf32>
    %c6 = arith.constant 6 : index
    %c0_31 = arith.constant 0 : index
    %c0_32 = arith.constant 0 : index
    %74 = vector.load %arg2[%c6, %c0_31, %c0_32] : memref<9x32x3xf32, #tpu.memory_space<vmem>>, vector<1x32x3xf32>
    %75 = vector.shape_cast %74 : vector<1x32x3xf32> to vector<32x3xf32>
    %cst_33 = arith.constant dense<0.000000e+00> : vector<32x256xf32>
    %76 = tpu.matmul %75, %73, %cst_33 {dimension_numbers = #tpu.dot_dimension_numbers<[1], [0], [0], [1], [0, 0, 1, 1], [], []>} : vector<32x3xf32>, vector<3x256xf32>, vector<32x256xf32> -> vector<32x256xf32>
    %77 = arith.addf %70, %76 : vector<32x256xf32>
    %78 = vector.extract_strided_slice %31 {offsets = [0, 144], sizes = [3, 256], strides = [1, 1]} : vector<3x512xf32> to vector<3x256xf32>
    %c7 = arith.constant 7 : index
    %c0_34 = arith.constant 0 : index
    %c0_35 = arith.constant 0 : index
    %79 = vector.load %arg2[%c7, %c0_34, %c0_35] : memref<9x32x3xf32, #tpu.memory_space<vmem>>, vector<1x32x3xf32>
    %80 = vector.shape_cast %79 : vector<1x32x3xf32> to vector<32x3xf32>
    %cst_36 = arith.constant dense<0.000000e+00> : vector<32x256xf32>
    %81 = tpu.matmul %80, %78, %cst_36 {dimension_numbers = #tpu.dot_dimension_numbers<[1], [0], [0], [1], [0, 0, 1, 1], [], []>} : vector<32x3xf32>, vector<3x256xf32>, vector<32x256xf32> -> vector<32x256xf32>
    %82 = arith.addf %77, %81 : vector<32x256xf32>
    %83 = vector.extract_strided_slice %31 {offsets = [0, 145], sizes = [3, 256], strides = [1, 1]} : vector<3x512xf32> to vector<3x256xf32>
    %84 = vector.broadcast %24 : vector<1x256xf32> to vector<3x256xf32>
    %85 = arith.mulf %83, %84 : vector<3x256xf32>
    %c8 = arith.constant 8 : index
    %c0_37 = arith.constant 0 : index
    %c0_38 = arith.constant 0 : index
    %86 = vector.load %arg2[%c8, %c0_37, %c0_38] : memref<9x32x3xf32, #tpu.memory_space<vmem>>, vector<1x32x3xf32>
    %87 = vector.shape_cast %86 : vector<1x32x3xf32> to vector<32x3xf32>
    %cst_39 = arith.constant dense<0.000000e+00> : vector<32x256xf32>
    %88 = tpu.matmul %87, %85, %cst_39 {dimension_numbers = #tpu.dot_dimension_numbers<[1], [0], [0], [1], [0, 0, 1, 1], [], []>} : vector<32x3xf32>, vector<3x256xf32>, vector<32x256xf32> -> vector<32x256xf32>
    %89 = arith.addf %82, %88 : vector<32x256xf32>
    %90 = vector.broadcast %25 : vector<32x1xf32> to vector<32x256xf32>
    %91 = arith.addf %89, %90 : vector<32x256xf32>
    %cst_40 = arith.constant 0.000000e+00 : f32
    %92 = vector.broadcast %cst_40 : f32 to vector<32x256xf32>
    %93 = arith.maximumf %91, %92 : vector<32x256xf32>
    %94 = tpu.concatenate %28, %93, %28 in 1 : vector<32x128xf32>, vector<32x256xf32>, vector<32x128xf32> -> vector<32x512xf32>
    %cst_41 = arith.constant 0.000000e+00 : f32
    %95 = vector.broadcast %cst_41 : f32 to vector<64x256xf32>
    %96 = vector.extract_strided_slice %94 {offsets = [0, 111], sizes = [32, 256], strides = [1, 1]} : vector<32x512xf32> to vector<32x256xf32>
    %97 = vector.broadcast %20 : vector<1x256xf32> to vector<32x256xf32>
    %98 = arith.mulf %96, %97 : vector<32x256xf32>
    %99 = vector.extract_strided_slice %94 {offsets = [0, 112], sizes = [32, 256], strides = [1, 1]} : vector<32x512xf32> to vector<32x256xf32>
    %100 = vector.extract_strided_slice %94 {offsets = [0, 113], sizes = [32, 256], strides = [1, 1]} : vector<32x512xf32> to vector<32x256xf32>
    %101 = vector.broadcast %24 : vector<1x256xf32> to vector<32x256xf32>
    %102 = arith.mulf %100, %101 : vector<32x256xf32>
    %103 = tpu.concatenate %98, %99, %102 in 0 : vector<32x256xf32>, vector<32x256xf32>, vector<32x256xf32> -> vector<96x256xf32>
    %c0_42 = arith.constant 0 : index
    %c0_43 = arith.constant 0 : index
    %c0_44 = arith.constant 0 : index
    %104 = vector.load %arg4[%c0_42, %c0_43, %c0_44] : memref<3x64x96xf32, #tpu.memory_space<vmem>>, vector<1x64x96xf32>
    %105 = vector.shape_cast %104 : vector<1x64x96xf32> to vector<64x96xf32>
    %cst_45 = arith.constant dense<0.000000e+00> : vector<64x256xf32>
    %106 = tpu.matmul %105, %103, %cst_45 {dimension_numbers = #tpu.dot_dimension_numbers<[1], [0], [0], [1], [0, 0, 1, 1], [], []>} : vector<64x96xf32>, vector<96x256xf32>, vector<64x256xf32> -> vector<64x256xf32>
    %107 = arith.addf %95, %106 : vector<64x256xf32>
    %108 = vector.extract_strided_slice %94 {offsets = [0, 127], sizes = [32, 256], strides = [1, 1]} : vector<32x512xf32> to vector<32x256xf32>
    %109 = vector.broadcast %20 : vector<1x256xf32> to vector<32x256xf32>
    %110 = arith.mulf %108, %109 : vector<32x256xf32>
    %111 = vector.extract_strided_slice %94 {offsets = [0, 128], sizes = [32, 256], strides = [1, 1]} : vector<32x512xf32> to vector<32x256xf32>
    %112 = vector.extract_strided_slice %94 {offsets = [0, 129], sizes = [32, 256], strides = [1, 1]} : vector<32x512xf32> to vector<32x256xf32>
    %113 = vector.broadcast %24 : vector<1x256xf32> to vector<32x256xf32>
    %114 = arith.mulf %112, %113 : vector<32x256xf32>
    %115 = tpu.concatenate %110, %111, %114 in 0 : vector<32x256xf32>, vector<32x256xf32>, vector<32x256xf32> -> vector<96x256xf32>
    %c1_46 = arith.constant 1 : index
    %c0_47 = arith.constant 0 : index
    %c0_48 = arith.constant 0 : index
    %116 = vector.load %arg4[%c1_46, %c0_47, %c0_48] : memref<3x64x96xf32, #tpu.memory_space<vmem>>, vector<1x64x96xf32>
    %117 = vector.shape_cast %116 : vector<1x64x96xf32> to vector<64x96xf32>
    %cst_49 = arith.constant dense<0.000000e+00> : vector<64x256xf32>
    %118 = tpu.matmul %117, %115, %cst_49 {dimension_numbers = #tpu.dot_dimension_numbers<[1], [0], [0], [1], [0, 0, 1, 1], [], []>} : vector<64x96xf32>, vector<96x256xf32>, vector<64x256xf32> -> vector<64x256xf32>
    %119 = arith.addf %107, %118 : vector<64x256xf32>
    %120 = vector.extract_strided_slice %94 {offsets = [0, 143], sizes = [32, 256], strides = [1, 1]} : vector<32x512xf32> to vector<32x256xf32>
    %121 = vector.broadcast %20 : vector<1x256xf32> to vector<32x256xf32>
    %122 = arith.mulf %120, %121 : vector<32x256xf32>
    %123 = vector.extract_strided_slice %94 {offsets = [0, 144], sizes = [32, 256], strides = [1, 1]} : vector<32x512xf32> to vector<32x256xf32>
    %124 = vector.extract_strided_slice %94 {offsets = [0, 145], sizes = [32, 256], strides = [1, 1]} : vector<32x512xf32> to vector<32x256xf32>
    %125 = vector.broadcast %24 : vector<1x256xf32> to vector<32x256xf32>
    %126 = arith.mulf %124, %125 : vector<32x256xf32>
    %127 = tpu.concatenate %122, %123, %126 in 0 : vector<32x256xf32>, vector<32x256xf32>, vector<32x256xf32> -> vector<96x256xf32>
    %c2_50 = arith.constant 2 : index
    %c0_51 = arith.constant 0 : index
    %c0_52 = arith.constant 0 : index
    %128 = vector.load %arg4[%c2_50, %c0_51, %c0_52] : memref<3x64x96xf32, #tpu.memory_space<vmem>>, vector<1x64x96xf32>
    %129 = vector.shape_cast %128 : vector<1x64x96xf32> to vector<64x96xf32>
    %cst_53 = arith.constant dense<0.000000e+00> : vector<64x256xf32>
    %130 = tpu.matmul %129, %127, %cst_53 {dimension_numbers = #tpu.dot_dimension_numbers<[1], [0], [0], [1], [0, 0, 1, 1], [], []>} : vector<64x96xf32>, vector<96x256xf32>, vector<64x256xf32> -> vector<64x256xf32>
    %131 = arith.addf %119, %130 : vector<64x256xf32>
    %132 = vector.broadcast %26 : vector<64x1xf32> to vector<64x256xf32>
    %133 = arith.addf %131, %132 : vector<64x256xf32>
    %cst_54 = arith.constant 0.000000e+00 : f32
    %134 = vector.broadcast %cst_54 : f32 to vector<64x256xf32>
    %135 = arith.maximumf %133, %134 : vector<64x256xf32>
    %c0_55 = arith.constant 0 : index
    %c0_56 = arith.constant 0 : index
    %c0_57 = arith.constant 0 : index
    %136 = vector.load %arg6[%c0_55, %c0_56, %c0_57] : memref<1x64x256xf32, #tpu.memory_space<vmem>>, vector<1x64x256xf32>
    %137 = vector.shape_cast %136 : vector<1x64x256xf32> to vector<64x256xf32>
    %138 = vector.shape_cast %135 : vector<64x256xf32> to vector<1x64x256xf32>
    tpu.vector_store %arg6[%c0_55, %c0_56, %c0_57], %138 {strides = array<i32>} : memref<1x64x256xf32, #tpu.memory_space<vmem>>, vector<1x64x256xf32>,
    return
  }
  func.func @transform_0(%arg0: i32) -> (i32, i32, i32) {
    %c0_i32 = arith.constant 0 : i32
    %c0_i32_0 = arith.constant 0 : i32
    %c0_i32_1 = arith.constant 0 : i32
    return %arg0, %c0_i32, %c0_i32_0 : i32, i32, i32
  }
  func.func @transform_1(%arg0: i32) -> (i32, i32, i32) {
    %c0_i32 = arith.constant 0 : i32
    %c0_i32_0 = arith.constant 0 : i32
    %c0_i32_1 = arith.constant 0 : i32
    %c0_i32_2 = arith.constant 0 : i32
    return %c0_i32, %c0_i32_0, %c0_i32_1 : i32, i32, i32
  }
  func.func @transform_2(%arg0: i32) -> (i32, i32) {
    %c0_i32 = arith.constant 0 : i32
    %c0_i32_0 = arith.constant 0 : i32
    %c0_i32_1 = arith.constant 0 : i32
    return %c0_i32, %c0_i32_0 : i32, i32
  }
  func.func @transform_3(%arg0: i32) -> (i32, i32, i32) {
    %c0_i32 = arith.constant 0 : i32
    %c0_i32_0 = arith.constant 0 : i32
    %c0_i32_1 = arith.constant 0 : i32
    %c0_i32_2 = arith.constant 0 : i32
    return %c0_i32, %c0_i32_0, %c0_i32_1 : i32, i32, i32
  }
  func.func @transform_4(%arg0: i32) -> (i32, i32) {
    %c0_i32 = arith.constant 0 : i32
    %c0_i32_0 = arith.constant 0 : i32
    %c0_i32_1 = arith.constant 0 : i32
    return %c0_i32, %c0_i32_0 : i32, i32
  }
  func.func @transform_5(%arg0: i32) -> (i32, i32, i32) {
    %c0_i32 = arith.constant 0 : i32
    %c0_i32_0 = arith.constant 0 : i32
    %c0_i32_1 = arith.constant 0 : i32
    return %arg0, %c0_i32, %c0_i32_0 : i32, i32, i32
  }
}

</mosaic_0001>

<bundles_post_ra>
// kernel: tpu_custom_call.1
= control target key start
LH: loop header
LB: loop body
LE: loop exit
PB: predicated region body
PF: predicated region fallthrough
CT: control target
= control target key end

     0   :  { %10 = vsyncpa [#allocation3], 0  ;;  %s4350_s0 = inlined_call_operand.vmem [shape: f32[2,3,256], index: 0, kind: input, shape index: {}]   ;;  %s4351_s1 = inlined_call_operand.vmem [shape: f32[9,32,3], index: 1, kind: input, shape index: {}]   ;;  %s4352_s2 = inlined_call_operand.vmem [shape: f32[32,1], index: 2, kind: input, shape index: {}]   ;;  %s4353_s3 = inlined_call_operand.vmem [shape: f32[3,64,96], index: 3, kind: input, shape index: {}]   ;;  %s4354_s4 = inlined_call_operand.vmem [shape: f32[64,1], index: 4, kind: input, shape index: {}]   ;;  %s4355_s5 = inlined_call_operand.hbm [shape: f32[2,64,256], index: 5, kind: output, shape index: {}]  }
   0x1   :  { %12 = vsyncpa [#allocation3 + $0x1], 0  ;;  %s3016_s18 = smov 0   ;;  %s3018_s19 = smov 0  }
   0x2   :  { %s3020_s20 = smov 0   ;;  %s3022_s21 = smov 0  }
   0x3 LB: > { %s3037_s22 = sadd.s32 4294967295, %s2972_s21   ;;  %s2310_s23 = sadd.s32 4294967294, %s2972_s21   ;;  %s2972_s21 = sphi %s3022_s21, %s4446_s21   ;;  %s2968_s20 = sphi %s3020_s20, %s4445_s20   ;;  %s2964_s19 = sphi %s3018_s19, %s4444_s19   ;;  %s2960_s18 = sphi %s3016_s18, %s4443_s18  }
   0x4   : > { %s3041_s24 = sadd.s32 1, %s2972_s21   ;;  %s135_s25 = sadd.s32 1, %s2968_s20 }
   0x5   : > { %s132_s26 = ssub.s32 %s2972_s21, %s3041_s24  ;;  %p145_p0 = scmp.ne.s32.totalorder %s2968_s20, %s2964_s19 }
   0x6   : > { %p133_p1 = scmp.eq.s32.totalorder %s132_s26, 0  ;;  %p146_p2 = scmp.eq.s32.totalorder %s3037_s22, 1 }
   0x7   : > { %p151_p3 = scmp.ne.s32.totalorder %s2964_s19, %s2960_s18  ;;  %p152_p4 = scmp.eq.s32.totalorder %s2310_s23, 1 }
   0x8   : > { %s3052_s27 = scalar_select %p133_p1, %s2968_s20, %s135_s25  }
   0x9   : > { %p3054_p5 = por %p146_p2, %p145_p0  ;;  %p3058_p6 = por %p152_p4, %p151_p3 }
   0xa   : > { %p2313_p7 = scmp.ge.s32.totalorder %s2972_s21, 1  ;;  %p190_p8 = scmp.lt.s32.totalorder %s2972_s21, 3 }
   0xc   : > { %p191_p9 = pnand %p2313_p7, %p190_p8 }
   0xe   : > { %194 = sbr.rel (%p191_p9) target bundleno = 1250 (0x4e2), region = 40 }
  0x13   : > { %v223_v0 = vlaneseq  ;;  %p218_p10 = scmp.lt.s32.totalorder %s3037_s22, 1  ;;  %v4356_v5 = vmov 0.0   ;;  %s2975_s10 = smov 111   ;;  %vm287_vm4 = vcmask 908288   ;;  %vm482_vm5 = vcmask 924672   ;;  %v2321_v41 = vld [vmem:[%s4351_s1 + $0x20] sm:$0xff] }
  0x14   : > { %s2976_s11 = smov 113   ;;  %s2977_s12 = smov 16   ;;  %vm593_vm6 = vcmask 1039360   ;;  %vm311_vm7 = vcmask 130048   ;;  %vm327_vm8 = vcmask 1042432   ;;  %vm314_vm9 = vcmask 23552  }
  0x15   : > { %v224_v1 = vand.u32 127, %v223_v0  ;;  %s219_s30 = scalar_select %p218_p10, %s3037_s22, 1  ;;  %v2322_v42 = vld [vmem:[%s4351_s1 + $0x28] sm:$0xff]  ;;  %v2323_v43 = vld [vmem:[%s4351_s1 + $0x30] sm:$0xff]  ;;  %v2324_v44 = vld [vmem:[%s4351_s1 + $0x38] sm:$0xff]  ;;  %vm399_vm10 = vcmask 138240  }
  0x16   : > { %s2978_s13 = smov 127   ;;  %s2979_s14 = smov 17   ;;  %v295_v50 = vld [vmem:[%s4351_s1] sm:$0xff]  ;;  %v297_v51 = vld [vmem:[%s4351_s1 + $0x10] sm:$0xff]  ;;  %vm504_vm11 = vcmask 121856   ;;  %v296_v57 = vld [vmem:[%s4351_s1 + $0x8] sm:$0xff] }
  0x17   : > { %v225_v2 = vadd.s32 128, %v224_v1  ;;  %v230_v3 = vand.u32 15, %v224_v1  ;;  %s2512_s6 = sshll.u32 %s219_s30, 3  ;;  %s2980_s15 = smov 15   ;;  %v298_v58 = vld [vmem:[%s4351_s1 + $0x18] sm:$0xff]  ;;  %vm615_vm12 = vcmask 7168  }
  0x18   : > { %s222_s9 = scalar_lea.vmem %s4350_s0, %s2512_s6  ;;  %s2981_s16 = smov 1   ;;  %vm1016_vm13 = vcmask 916480   ;;  %vm1322_vm14 = vcmask 1031168   ;;  %vm1518_vm15 = vcmask 785408  }
  0x19   : > { %v237_v4 = vand.u32 15, %v225_v2  ;;  %vm250_vm0 = vcmp.gt.s32.totalorder %v230_v3, 0  ;;  %vm256_vm1 = vcmp.lt.s32.totalorder %v230_v3, 15  ;;  %v274_v8 = vld [vmem:[%s222_s9] sm:$0x77]  ;;  %s2982_s7 = smov 112  }
  0x1a   : > { %v2317_v6 = vsel %vm250_vm0, 1.0, %v4356_v5  ;;  %v2319_v7 = vsel %vm256_vm1, 1.0, %v4356_v5  ;;  %276 = vst [vmem:[#allocation1] ss:$2 sm:$0xff] %v274_v8  ;;  %s2513_s25 = sshll.u32 %s3037_s22, 7  ;;  %s2930_s8 = scalar_lea.hbm %s4355_s5, 256 }
  0x1b   : > { %vm251_vm2 = vcmp.gt.s32.totalorder %v237_v4, 0  ;;  %vm257_vm3 = vcmp.lt.s32.totalorder %v237_v4, 15  ;;  %v2345_v4 = vld [vmem:[%s4351_s1 + $0x40] sm:$0xff] }
  0x1c   : > { %v2318_v9 = vsel %vm251_vm2, 1.0, %v4356_v5  ;;  %v2320_v10 = vsel %vm257_vm3, 1.0, %v4356_v5 }
  0x1d   : > { %v2567_v11 = vpack.i.bf16 %v2318_v9, %v2317_v6  ;;  %v2572_v12 = vpack.i.bf16 %v2320_v10, %v2319_v7  ;;  %v2359_v10 = vld [vmem:[%s4351_s1 + $0x60] sm:$0xff] }
  0x1f   : > { %2568 = vrot.lane.b32.xlu0 %v2567_v11, %s2975_s10  ;;  %2573 = vrot.lane.b32.xlu2 %v2572_v12, %s2976_s11 }
  0x21   : > { %v3075_v13 = vld.sshfl [vmem:[#allocation1] sm:$0xff pattern:$0x75316420]  ;;  %v3082_v14 = vld.sshfl [vmem:[#allocation1 + $0x8] sm:$0xff pattern:$0x75316420] }
  0x22   : > { %307 = vrot.lane.b32.xlu1 %v3075_v13, %s2977_s12 }
  0x27   : > { %2578 = vrot.lane.b32.xlu2 %v2567_v11, %s2978_s13  ;;  %305 = vrot.lane.b32.xlu0 %v4356_v5, %s2977_s12 }
  0x2a   : > { %309 = vrot.lane.b32.xlu1 %v3082_v14, %s2977_s12 }
  0x79   : > { %v2574_v15 = vpop.permute.xlu2 %2573 }
  0x7a   : > { %v3088_v19 = vunpack.i.h.bf16 %v2574_v15  ;;  %v2575_v23 = vunpack.i.l.bf16 %v2574_v15 }
  0x7c   : > { %4386 = vst [vmem:[#allocation5_spill] sm:$0xff] %v3088_v19  ;;  %v3103_v25 = vsel %vm482_vm5, %v2575_v23, %v3088_v19  ;;  %v3105_v26 = vmul.f32 0.0, %v2575_v23  ;;  %v489_v27 = vmul.f32 %v3088_v19, %v3082_v14 }
  0x7d   : > { %v488_v28 = vmul.f32 %v3103_v25, %v3075_v13 }
  0x81   : > { %v2579_v29 = vpop.permute.xlu2 %2578 }
  0x82   : > { %v2580_v30 = vunpack.i.l.bf16 %v2579_v29  ;;  %v3112_v32 = vunpack.i.h.bf16 %v2579_v29  ;;  %v2347_v29 = vld [vmem:[%s4351_s1 + $0x50] sm:$0xff] }
  0x84   : > { %v598_v31 = vmul.f32 0.0, %v2580_v30  ;;  %v3118_v33 = vsel %vm593_vm6, %v2580_v30, %v3112_v32  ;;  %v600_v35 = vmul.f32 %v3112_v32, %v3082_v14 }
  0x85   : > { %v599_v34 = vmul.f32 %v3118_v33, %v3075_v13 }
  0x91   : > { %v2569_v16 = vpop.permute.xlu0 %2568 }
  0x92   : > { %v3086_v17 = vunpack.i.h.bf16 %v2569_v16  ;;  %v2570_v18 = vunpack.i.l.bf16 %v2569_v16 }
  0x94   : > { %v3092_v20 = vsel %vm287_vm4, %v2570_v18, %v3086_v17  ;;  %v292_v21 = vmul.f32 0.0, %v2570_v18  ;;  %v294_v22 = vmul.f32 %v3086_v17, %v3082_v14  ;;  %v308_v36 = vpop.permute.xlu1 %307 }
  0x95   : > { %v293_v24 = vmul.f32 %v3092_v20, %v3075_v13 }
  0x96   : > { %393 = vrot.lane.b32.xlu0 %v292_v21, %s2979_s14  ;;  %397 = vrot.lane.b32.xlu2 %v294_v22, %s2979_s14  ;;  %v2346_v22 = vld [vmem:[%s4351_s1 + $0x48] sm:$0xff] }
  0x97   : > { %395 = vrot.lane.b32.xlu1 %v293_v24, %s2979_s14  ;;  %v2360_v24 = vld [vmem:[%s4351_s1 + $0x68] sm:$0xff] }
  0x99   : > { %v306_v37 = vpop.permute.xlu0 %305 }
  0x9a   : > { %v312_v39 = vsel %vm311_vm7, %v306_v37, %v308_v36  ;;  %v2348_v37 = vld [vmem:[%s4351_s1 + $0x58] sm:$0xff] }
  0x9b   : > { %2325 = vmatpush.msk.msra.mxu0 %vm327_vm8, %v312_v39  ;;  %v2375_v39 = vld [vmem:[%s4351_s1 + $0x90] sm:$0xff] }
  0x9c   : > { %v310_v38 = vpop.permute.xlu1 %309  ;;  %2326 = vmatmul.msk.f32.vlgmr.msra.gmra.mxu0 %vm314_vm9, %v2321_v41 }
  0x9d   : > { %v313_v40 = vsel %vm311_vm7, %v308_v36, %v310_v38  ;;  %v2374_v38 = vld [vmem:[%s4351_s1 + $0x88] sm:$0xff] }
  0x9e   : > { %498 = vrot.lane.b32.xlu0 %v3105_v26, %s2980_s15  ;;  %502 = vrot.lane.b32.xlu2 %v489_v27, %s2980_s15 }
  0x9f   : > { %500 = vrot.lane.b32.xlu1 %v488_v28, %s2980_s15  ;;  %2330 = vmatpush.msk.msra.mxu1 %vm327_vm8, %v313_v40  ;;  %v2376_v40 = vld [vmem:[%s4351_s1 + $0x98] sm:$0xff] }
  0xa0   : > { %2331 = vmatmul.msk.f32.vlgmr.msra.gmra.mxu1 %vm314_vm9, %v2321_v41 }
  0xa4   : > { %2327 = vmatmul.msk.f32.gmra.mxu0 %vm314_vm9, %v2322_v42 }
  0xa6   : > { %2583 = vrot.lane.b32.xlu0 %v2572_v12, %s2981_s16  ;;  %609 = vrot.lane.b32.xlu2 %v598_v31, %s2981_s16  ;;  %v2361_v31 = vld [vmem:[%s4351_s1 + $0x70] sm:$0xff] }
  0xa7   : > { %2588 = vrot.lane.b32.xlu1 %v2567_v11, %s2980_s15  ;;  %s215_s15 = sand.u32 1, %s2964_s19  }
  0xa8   : > { %2332 = vmatmul.msk.f32.gmra.mxu1 %vm314_vm9, %v2322_v42  ;;  %s2314_s17 = sshll.u32 %s215_s15, 7  ;;  %s2233_s6 = scalar_lea.sflag [#allocation3], %s215_s15 }
  0xa9   : > { %s4289_s23 = scalar_lea.vmem [#allocation2], %s2314_s17 }
  0xaa   : > { %s2245_s22 = sshll.u32 %s4289_s23, 4  ;;  %s2246_s22 = int_to_ptr.vmem [resolvable:$true] %s2245_s22 }
  0xac   : > { %2328 = vmatmul.msk.f32.gmra.mxu0 %vm314_vm9, %v2323_v43 }
  0xae   : > { %611 = vrot.lane.b32.xlu0 %v599_v34, %s2981_s16  ;;  %2593 = vrot.lane.b32.xlu2 %v2572_v12, %s2979_s14 }
  0xaf   : > { %613 = vrot.lane.b32.xlu1 %v600_v35, %s2981_s16 }
  0xb0   : > { %2333 = vmatmul.msk.f32.gmra.mxu1 %vm314_vm9, %v2323_v43 }
  0xb4   : > { %2329 = vmatmul.msk.f32.gmra.mxu0 %vm314_vm9, %v2324_v44 }
  0xb8   : > { %2334 = vmatmul.msk.f32.gmra.mxu1 %vm314_vm9, %v2324_v44 }
  0xf0   : > { %v398_v45 = vpop.permute.xlu2 %397 }
  0xf8   : > { %v503_v53 = vpop.permute.xlu2 %502 }
 0x100   : > { %v3208_v7 = vpop.permute.xlu2 %609 }
 0x101   : > { %4389 = vst [vmem:[#allocation8_spill] sm:$0xff] %v3208_v7 }
 0x108   : > { %v3149_v46 = vpop.permute.xlu0 %393  ;;  %v2594_v23 = vpop.permute.xlu2 %2593 }
 0x109   : > { %4387 = vst [vmem:[#allocation6_spill] sm:$0xff] %v3149_v46  ;;  %v396_v47 = vpop.permute.xlu1 %395  ;;  %v2596_v27 = vunpack.i.h.bf16 %v2594_v23  ;;  %v3240_v28 = vunpack.i.l.bf16 %v2594_v23  ;;  %v2983_v23 = vmov 0  }
 0x10a   : > { %v400_v48 = vsel %vm399_vm10, %v3149_v46, %v396_v47  ;;  %v401_v49 = vsel %vm399_vm10, %v396_v47, %v398_v45  ;;  %2597 = vset.pattern.permute.xlu0 %v2983_v23  ;;  %2598 = vset.pattern.permute.xlu1 %v2983_v23 }
 0x10b   : > { %2335 = vmatpush.msk.msrb.mxu0 %vm327_vm8, %v400_v48  ;;  %2514 = vmatpush.msk.msra.mxu2 %vm327_vm8, %v400_v48  ;;  %4390 = vst [vmem:[#allocation9_spill] sm:$0xff] %v3240_v28  ;;  %v3253_v30 = vsel %vm399_vm10, %v3240_v28, %v2596_v27  ;;  %v3259_v34 = vmul.f32 0.0, %v2596_v27  ;;  %v1109_v35 = vmul.f32 %v3240_v28, %v3075_v13 }
 0x10c   : > { %2340 = vmatpush.msk.msrb.mxu1 %vm327_vm8, %v401_v49  ;;  %2515 = vmatpush.msk.msra.mxu3 %vm327_vm8, %v401_v49  ;;  %4391 = vst [vmem:[#allocation10_spill] sm:$0xff] %v3253_v30  ;;  %v1110_v36 = vmul.f32 %v3253_v30, %v3082_v14 }
 0x10d   : > { %2336 = vmatmul.msk.f32.vlgmr.msrb.gmra.mxu0 %vm314_vm9, %v295_v50  ;;  %2341 = vmatmul.msk.f32.vlgmr.msrb.gmra.mxu1 %vm314_vm9, %v295_v50  ;;  %4392 = vst [vmem:[#allocation11_spill] sm:$0xff] %v3259_v34 }
 0x10e   : > { %2338 = vmatmul.msk.f32.vlgmr.msra.gmra.mxu2 %vm314_vm9, %v297_v51  ;;  %2343 = vmatmul.msk.f32.vlgmr.msra.gmra.mxu3 %vm314_vm9, %v297_v51  ;;  %v2387_v51 = vld [vmem:[%s4351_s1 + $0xa0] sm:$0xff] }
 0x10f   : > { %2599 = vset.pattern.permute.xlu2 %v2983_v23 }
 0x110   : > { %v499_v52 = vpop.permute.xlu0 %498 }
 0x111   : > { %v501_v54 = vpop.permute.xlu1 %500 }
 0x112   : > { %v505_v55 = vsel %vm504_vm11, %v499_v52, %v501_v54  ;;  %v506_v56 = vsel %vm504_vm11, %v501_v54, %v503_v53 }
 0x113   : > { %2349 = vmatpush.msk.msra.mxu0 %vm327_vm8, %v505_v55  ;;  %2354 = vmatpush.msk.msra.mxu1 %vm327_vm8, %v506_v56 }
 0x115   : > { %2377 = vmatpush.msk.msrb.mxu0 %vm327_vm8, %v3075_v13  ;;  %2382 = vmatpush.msk.msrb.mxu1 %vm327_vm8, %v3082_v14 }
 0x116   : > { %2337 = vmatmul.msk.f32.gmra.mxu0 %vm314_vm9, %v296_v57  ;;  %2342 = vmatmul.msk.f32.gmra.mxu1 %vm314_vm9, %v296_v57 }
 0x117   : > { %2339 = vmatmul.msk.f32.gmra.mxu2 %vm314_vm9, %v298_v58  ;;  %2344 = vmatmul.msk.f32.gmra.mxu3 %vm314_vm9, %v298_v58  ;;  %v2388_v58 = vld [vmem:[%s4351_s1 + $0xa8] sm:$0xff] }
 0x118   : > { %v2584_v59 = vpop.permute.xlu0 %2583 }
 0x119   : > { %v2586_v60 = vunpack.i.h.bf16 %v2584_v59  ;;  %v3186_v61 = vunpack.i.l.bf16 %v2584_v59  ;;  %v2589_v62 = vpop.permute.xlu1 %2588  ;;  %v3311_v48 = vpop.f32.mrf.mxu0 }
 0x11a   : > { %v2591_v63 = vunpack.i.h.bf16 %v2589_v62  ;;  %v3196_v3 = vunpack.i.l.bf16 %v2589_v62 }
 0x11b   : > { %4388 = vst [vmem:[#allocation7_spill] sm:$0xff] %v3186_v61  ;;  %v3188_v0 = vmul.f32 0.0, %v2586_v60  ;;  %v3192_v1 = vsel %vm615_vm12, %v3186_v61, %v2586_v60  ;;  %v795_v2 = vmul.f32 %v3186_v61, %v3075_v13 }
 0x11c   : > { %v796_v6 = vmul.f32 %v3192_v1, %v3082_v14  ;;  %v3212_v8 = vsel %vm504_vm11, %v3196_v3, %v2591_v63  ;;  %v906_v11 = vmul.f32 0.0, %v2591_v63  ;;  %v904_v12 = vmul.f32 %v3196_v3, %v3075_v13  ;;  %v2401_v63 = vld [vmem:[%s4351_s1 + $0xc0] sm:$0xff] }
 0x11d   : > { %810 = vrot.lane.b32.xlu2 %v3188_v0, %s2978_s13  ;;  %806 = vrot.lane.b32.xlu0 %v795_v2, %s2978_s13  ;;  %v905_v18 = vmul.f32 %v3212_v8, %v3082_v14  ;;  %v3301_v41 = vpop.f32.mrf.mxu1 }
 0x11e   : > { %808 = vrot.lane.b32.xlu1 %v796_v6, %s2978_s13  ;;  %2350 = vmatmul.msk.f32.vlgmr.msra.gmra.mxu0 %vm314_vm9, %v2345_v4 }
 0x11f   : > { %2355 = vmatmul.msk.f32.vlgmr.msra.gmra.mxu1 %vm314_vm9, %v2345_v4 }
 0x120   : > { %v612_v9 = vpop.permute.xlu0 %611 }
 0x121   : > { %v614_v15 = vpop.permute.xlu1 %613  ;;  %v616_v16 = vsel %vm615_vm12, %v3208_v7, %v612_v9  ;;  %v3329_v59 = vpop.f32.mrf.mxu0 }
 0x122   : > { %2363 = vmatpush.msk.msrb.mxu2 %vm327_vm8, %v616_v16  ;;  %v617_v21 = vsel %vm615_vm12, %v612_v9, %v614_v15  ;;  %v2402_v15 = vld [vmem:[%s4351_s1 + $0xc8] sm:$0xff] }
 0x123   : > { %2368 = vmatpush.msk.msrb.mxu3 %vm327_vm8, %v617_v21  ;;  %2364 = vmatmul.msk.f32.vlgmr.msrb.gmra.mxu2 %vm314_vm9, %v2359_v10 }
 0x124   : > { %2369 = vmatmul.msk.f32.vlgmr.msrb.gmra.mxu3 %vm314_vm9, %v2359_v10  ;;  %v2389_v10 = vld [vmem:[%s4351_s1 + $0xb0] sm:$0xff] }
 0x125   : > { %919 = vrot.lane.b32.xlu2 %v906_v11, %s2976_s11  ;;  %915 = vrot.lane.b32.xlu0 %v904_v12, %s2976_s11  ;;  %v3303_v42 = vpop.f32.mrf.mxu1 }
 0x126   : > { %917 = vrot.lane.b32.xlu1 %v905_v18, %s2976_s11  ;;  %2351 = vmatmul.msk.f32.gmra.mxu0 %vm314_vm9, %v2346_v22 }
 0x127   : > { %2356 = vmatmul.msk.f32.gmra.mxu1 %vm314_vm9, %v2346_v22  ;;  %v262_v22 = vld [vmem:[%s4352_s2] sm:$0xff] }
 0x129   : > { %v3353_v18 = vpop.f32.mrf.mxu0 }
 0x12b   : > { %2365 = vmatmul.msk.f32.gmra.mxu2 %vm314_vm9, %v2360_v24 }
 0x12c   : > { %2370 = vmatmul.msk.f32.gmra.mxu3 %vm314_vm9, %v2360_v24 }
 0x12d   : > { %1014 = vrot.lane.b32.xlu2 %v4356_v5, %s2982_s7  ;;  %1010 = vrot.lane.b32.xlu0 %v3075_v13, %s2982_s7  ;;  %v2362_v13 = vld [vmem:[%s4351_s1 + $0x78] sm:$0xff]  ;;  %v3305_v43 = vpop.f32.mrf.mxu1 }
 0x12e   : > { %1012 = vrot.lane.b32.xlu1 %v3082_v14, %s2982_s7  ;;  %2352 = vmatmul.msk.f32.gmra.mxu0 %vm314_vm9, %v2347_v29  ;;  %v2373_v14 = vld [vmem:[%s4351_s1 + $0x80] sm:$0xff]  ;;  %s2984_s7 = smov 126  }
 0x12f   : > { %2357 = vmatmul.msk.f32.gmra.mxu1 %vm314_vm9, %v2347_v29 }
 0x133   : > { %2366 = vmatmul.msk.f32.gmra.mxu2 %vm314_vm9, %v2361_v31 }
 0x134   : > { %2371 = vmatmul.msk.f32.gmra.mxu3 %vm314_vm9, %v2361_v31  ;;  %v2390_v31 = vld [vmem:[%s4351_s1 + $0xb8] sm:$0xff] }
 0x135   : > { %1124 = vrot.lane.b32.xlu2 %v3259_v34, %s2975_s10  ;;  %1120 = vrot.lane.b32.xlu0 %v1109_v35, %s2975_s10  ;;  %v3307_v44 = vpop.f32.mrf.mxu1 }
 0x136   : > { %1122 = vrot.lane.b32.xlu1 %v1110_v36, %s2975_s10  ;;  %2353 = vmatmul.msk.f32.gmra.mxu0 %vm314_vm9, %v2348_v37  ;;  %v2403_v36 = vld [vmem:[%s4351_s1 + $0xd0] sm:$0xff] }
 0x137   : > { %2358 = vmatmul.msk.f32.gmra.mxu1 %vm314_vm9, %v2348_v37 }
 0x13b   : > { %2367 = vmatmul.msk.f32.gmra.mxu2 %vm314_vm9, %v2362_v13 }
 0x13c   : > { %2372 = vmatmul.msk.f32.gmra.mxu3 %vm314_vm9, %v2362_v13 }
 0x13d   : > { %1212 = vperm.xlu0 %2597, %v262_v22  }
 0x13e   : > { %2378 = vmatmul.msk.f32.vlgmr.msrb.gmra.mxu0 %vm314_vm9, %v2373_v14 }
 0x13f   : > { %2383 = vmatmul.msk.f32.vlgmr.msrb.gmra.mxu1 %vm314_vm9, %v2373_v14 }
 0x146   : > { %2379 = vmatmul.msk.f32.gmra.mxu0 %vm314_vm9, %v2374_v38 }
 0x147   : > { %2384 = vmatmul.msk.f32.gmra.mxu1 %vm314_vm9, %v2374_v38  ;;  %v263_v38 = vld [vmem:[%s4352_s2 + $0x8] sm:$0xff] }
 0x148   : > { %1217 = vperm.xlu1 %2598, %v263_v38  }
 0x14e   : > { %2380 = vmatmul.msk.f32.gmra.mxu0 %vm314_vm9, %v2375_v39 }
 0x14f   : > { %2385 = vmatmul.msk.f32.gmra.mxu1 %vm314_vm9, %v2375_v39  ;;  %v3381_v39 = vpop.f32.mrf.mxu0 }
 0x156   : > { %2381 = vmatmul.msk.f32.gmra.mxu0 %vm314_vm9, %v2376_v40 }
 0x157   : > { %2386 = vmatmul.msk.f32.gmra.mxu1 %vm314_vm9, %v2376_v40  ;;  %v2415_v40 = vld [vmem:[%s4351_s1 + $0xe0] sm:$0xff] }
 0x177   : > { %v811_v47 = vpop.permute.xlu2 %810 }
 0x17f   : > { %v3324_v55 = vpop.permute.xlu2 %919 }
 0x180   : > { %4393 = vst [vmem:[#allocation12_spill] sm:$0xff] %v3324_v55 }
 0x187   : > { %v1015_v4 = vpop.permute.xlu2 %1014 }
 0x18a   : > { %v3309_v45 = vpop.f32.mrf.mxu1 }
 0x18f   : > { %v807_v49 = vpop.permute.xlu0 %806  ;;  %v1125_v27 = vpop.permute.xlu2 %1124 }
 0x190   : > { %v809_v50 = vpop.permute.xlu1 %808 }
 0x191   : > { %v812_v52 = vsel %vm593_vm6, %v807_v49, %v809_v50  ;;  %v813_v53 = vsel %vm593_vm6, %v809_v50, %v811_v47  ;;  %v470_v11 = vpop.f32.mrf.mxu3  ;;  %v2404_v47 = vld [vmem:[%s4351_s1 + $0xd8] sm:$0xff] }
 0x192   : > { %2391 = vmatpush.msk.msra.mxu2 %vm327_vm8, %v812_v52  ;;  %2396 = vmatpush.msk.msra.mxu3 %vm327_vm8, %v813_v53  ;;  %v264_v52 = vld [vmem:[%s4352_s2 + $0x10] sm:$0xff]  ;;  %v435_v53 = vpop.f32.mrf.mxu0 }
 0x193   : > { %v3320_v54 = vpop.f32.mrf.mxu1  ;;  %2392 = vmatmul.msk.f32.vlgmr.msra.gmra.mxu2 %vm314_vm9, %v2387_v51  ;;  %2397 = vmatmul.msk.f32.vlgmr.msra.gmra.mxu3 %vm314_vm9, %v2387_v51  ;;  %v265_v51 = vld [vmem:[%s4352_s2 + $0x18] sm:$0xff] }
 0x194   : > { %1227 = vperm.xlu1 %2598, %v265_v51   ;;  %1222 = vperm.xlu2 %2599, %v264_v52  }
 0x197   : > { %v916_v56 = vpop.permute.xlu0 %915 }
 0x198   : > { %v918_v57 = vpop.permute.xlu1 %917 }
 0x199   : > { %v921_v60 = vsel %vm482_vm5, %v916_v56, %v918_v57  ;;  %v922_v62 = vsel %vm482_vm5, %v918_v57, %v3324_v55  ;;  %v2416_v56 = vld [vmem:[%s4351_s1 + $0xe8] sm:$0xff]  ;;  %v2429_v57 = vld [vmem:[%s4351_s1 + $0x100] sm:$0xff] }
 0x19a   : > { %2405 = vmatpush.msk.msra.mxu0 %vm327_vm8, %v921_v60  ;;  %2410 = vmatpush.msk.msra.mxu1 %vm327_vm8, %v922_v62  ;;  %v3371_v13 = vpop.f32.mrf.mxu3 }
 0x19b   : > { %2393 = vmatmul.msk.f32.gmra.mxu2 %vm314_vm9, %v2388_v58  ;;  %2398 = vmatmul.msk.f32.gmra.mxu3 %vm314_vm9, %v2388_v58  ;;  %v468_v58 = vadd.f32 %v3320_v54, %v3303_v42  ;;  %v2430_v42 = vld [vmem:[%s4351_s1 + $0x108] sm:$0xff]  ;;  %v471_v54 = vadd.f32 %v470_v11, %v3305_v43  ;;  %v2431_v43 = vld [vmem:[%s4351_s1 + $0x110] sm:$0xff] }
 0x19c   : > { %2406 = vmatmul.msk.f32.vlgmr.msra.gmra.mxu0 %vm314_vm9, %v2401_v63  ;;  %2411 = vmatmul.msk.f32.vlgmr.msra.gmra.mxu1 %vm314_vm9, %v2401_v63  ;;  %v3343_v2 = vpop.f32.mrf.mxu1 }
 0x19f   : > { %v1011_v6 = vpop.permute.xlu0 %1010 }
 0x1a0   : > { %v1013_v9 = vpop.permute.xlu1 %1012 }
 0x1a1   : > { %v1018_v12 = vsel %vm1016_vm13, %v1013_v9, %v1015_v4  ;;  %v1017_v16 = vsel %vm1016_vm13, %v1011_v6, %v1013_v9  ;;  %v2417_v4 = vld [vmem:[%s4351_s1 + $0xf0] sm:$0xff]  ;;  %v438_v6 = vpop.f32.mrf.mxu0 }
 0x1a2   : > { %2419 = vmatpush.msk.msrb.mxu2 %vm327_vm8, %v1017_v16  ;;  %2424 = vmatpush.msk.msrb.mxu3 %vm327_vm8, %v1018_v12  ;;  %v2418_v16 = vld [vmem:[%s4351_s1 + $0xf8] sm:$0xff]  ;;  %v439_v7 = vadd.f32 %v438_v6, %v3329_v59 }
 0x1a3   : > { %2394 = vmatmul.msk.f32.gmra.mxu2 %vm314_vm9, %v2389_v10  ;;  %2399 = vmatmul.msk.f32.gmra.mxu3 %vm314_vm9, %v2389_v10 }
 0x1a4   : > { %2407 = vmatmul.msk.f32.gmra.mxu0 %vm314_vm9, %v2402_v15  ;;  %2412 = vmatmul.msk.f32.gmra.mxu1 %vm314_vm9, %v2402_v15  ;;  %v572_v21 = vpop.f32.mrf.mxu1 }
 0x1a5   : > { %v584_v63 = vadd.f32 %v572_v21, %v468_v58 }
 0x1a7   : > { %v1121_v24 = vpop.permute.xlu0 %1120  ;;  %v3395_v50 = vpop.f32.mrf.mxu3 }
 0x1a8   : > { %v1123_v29 = vpop.permute.xlu1 %1122 }
 0x1a9   : > { %v1127_v35 = vsel %vm287_vm4, %v1123_v29, %v1125_v27  ;;  %v1126_v37 = vsel %vm287_vm4, %v1121_v24, %v1123_v29  ;;  %v540_v11 = vpop.f32.mrf.mxu0  ;;  %v2432_v27 = vld [vmem:[%s4351_s1 + $0x118] sm:$0xff] }
 0x1aa   : > { %2438 = vmatpush.msk.msrb.mxu1 %vm327_vm8, %v1127_v35  ;;  %2433 = vmatpush.msk.msrb.mxu0 %vm327_vm8, %v1126_v37 }
 0x1ab   : > { %2395 = vmatmul.msk.f32.gmra.mxu2 %vm314_vm9, %v2390_v31  ;;  %2400 = vmatmul.msk.f32.gmra.mxu3 %vm314_vm9, %v2390_v31  ;;  %v441_v31 = vpop.f32.mrf.mxu2 }
 0x1ac   : > { %2408 = vmatmul.msk.f32.gmra.mxu0 %vm314_vm9, %v2403_v36  ;;  %2413 = vmatmul.msk.f32.gmra.mxu1 %vm314_vm9, %v2403_v36  ;;  %v575_v14 = vpop.f32.mrf.mxu1  ;;  %v442_v28 = vadd.f32 %v441_v31, %v3353_v18  ;;  %v474_v18 = vadd.f32 %v3371_v13, %v3307_v44 }
 0x1ad   : > { %v586_v15 = vadd.f32 %v575_v14, %v471_v54 }
 0x1af   : > { %v683_v62 = vpop.f32.mrf.mxu3 }
 0x1b0   : > { %v695_v9 = vadd.f32 %v683_v62, %v584_v63 }
 0x1b1   : > { %v543_v29 = vpop.f32.mrf.mxu0 }
 0x1b3   : > { %2420 = vmatmul.msk.f32.vlgmr.msrb.gmra.mxu2 %vm314_vm9, %v2415_v40  ;;  %2425 = vmatmul.msk.f32.vlgmr.msrb.gmra.mxu3 %vm314_vm9, %v2415_v40  ;;  %v444_v36 = vpop.f32.mrf.mxu2 }
 0x1b4   : > { %2409 = vmatmul.msk.f32.gmra.mxu0 %vm314_vm9, %v2404_v47  ;;  %2414 = vmatmul.msk.f32.gmra.mxu1 %vm314_vm9, %v2404_v47  ;;  %v3393_v49 = vpop.f32.mrf.mxu1 }
 0x1b7   : > { %v686_v21 = vpop.f32.mrf.mxu3 }
 0x1b8   : > { %v697_v22 = vadd.f32 %v686_v21, %v586_v15  ;;  %v436_v21 = vadd.f32 %v435_v53, %v3311_v48 }
 0x1b9   : > { %v546_v35 = vpop.f32.mrf.mxu0 }
 0x1bb   : > { %2421 = vmatmul.msk.f32.gmra.mxu2 %vm314_vm9, %v2416_v56  ;;  %2426 = vmatmul.msk.f32.gmra.mxu3 %vm314_vm9, %v2416_v56  ;;  %v651_v14 = vpop.f32.mrf.mxu2 }
 0x1bc   : > { %2434 = vmatmul.msk.f32.vlgmr.msrb.gmra.mxu0 %vm314_vm9, %v2429_v57  ;;  %2439 = vmatmul.msk.f32.vlgmr.msrb.gmra.mxu1 %vm314_vm9, %v2429_v57  ;;  %v3415_v60 = vpop.f32.mrf.mxu1 }
 0x1bf   : > { %v3451_v57 = vpop.f32.mrf.mxu3 }
 0x1c1   : > { %v549_v37 = vpop.f32.mrf.mxu0 }
 0x1c3   : > { %2422 = vmatmul.msk.f32.gmra.mxu2 %vm314_vm9, %v2417_v4  ;;  %2427 = vmatmul.msk.f32.gmra.mxu3 %vm314_vm9, %v2417_v4  ;;  %v654_v40 = vpop.f32.mrf.mxu2 }
 0x1c4   : > { %2435 = vmatmul.msk.f32.gmra.mxu0 %vm314_vm9, %v2430_v42  ;;  %2440 = vmatmul.msk.f32.gmra.mxu1 %vm314_vm9, %v2430_v42  ;;  %v770_v10 = vpop.f32.mrf.mxu1 }
 0x1c5   : > { %v3428_v12 = vadd.f32 %v770_v10, %v695_v9 }
 0x1c9   : > { %v738_v38 = vpop.f32.mrf.mxu0 }
 0x1cb   : > { %2423 = vmatmul.msk.f32.gmra.mxu2 %vm314_vm9, %v2418_v16  ;;  %2428 = vmatmul.msk.f32.gmra.mxu3 %vm314_vm9, %v2418_v16  ;;  %v657_v51 = vpop.f32.mrf.mxu2 }
 0x1cc   : > { %2436 = vmatmul.msk.f32.gmra.mxu0 %vm314_vm9, %v2431_v43  ;;  %2441 = vmatmul.msk.f32.gmra.mxu1 %vm314_vm9, %v2431_v43  ;;  %v773_v23 = vpop.f32.mrf.mxu1  ;;  %v465_v43 = vadd.f32 %v3309_v45, %v3301_v41  ;;  %v583_v45 = vadd.f32 %v543_v29, %v439_v7 }
 0x1cd   : > { %v3440_v24 = vadd.f32 %v773_v23, %v697_v22 }
 0x1ce   : > { %v582_v5 = vadd.f32 %v3343_v2, %v465_v43  ;;  %v694_v59 = vadd.f32 %v654_v40, %v583_v45 }
 0x1d0   : > { %v693_v61 = vadd.f32 %v3395_v50, %v582_v5 }
 0x1d1   : > { %v741_v47 = vpop.f32.mrf.mxu0 }
 0x1d2   : > { %v780_v41 = vadd.f32 %v3415_v60, %v693_v61  ;;  %v445_v61 = vadd.f32 %v444_v36, %v3381_v39 }
 0x1d3   : > { %v3449_v56 = vpop.f32.mrf.mxu2 }
 0x1d4   : > { %2437 = vmatmul.msk.f32.gmra.mxu0 %vm314_vm9, %v2432_v27  ;;  %2442 = vmatmul.msk.f32.gmra.mxu1 %vm314_vm9, %v2432_v27  ;;  %v3455_v62 = vpop.f32.mrf.mxu1  ;;  %v581_v27 = vadd.f32 %v540_v11, %v436_v21 }
 0x1d6   : > { %v692_v34 = vadd.f32 %v651_v14, %v581_v27  ;;  %v781_v27 = vadd.f32 %v741_v47, %v694_v59 }
 0x1d8   : > { %v779_v53 = vadd.f32 %v738_v38, %v692_v34  ;;  %v1213_v34 = vpop.permute.xlu0 %1212  ;;  %v585_v38 = vadd.f32 %v546_v35, %v442_v28 }
 0x1d9   : > { %v3447_v52 = vpop.f32.mrf.mxu0 }
 0x1da   : > { %v696_v47 = vadd.f32 %v657_v51, %v585_v38 }
 0x1e1   : > { %v3453_v58 = vpop.f32.mrf.mxu0 }
 0x216   : > { %v847_v63 = vpop.f32.mrf.mxu2  ;;  %v876_v4 = vpop.f32.mrf.mxu3 }
 0x217   : > { %v888_v11 = vadd.f32 %v847_v63, %v779_v53  ;;  %v889_v21 = vadd.f32 %v876_v4, %v780_v41 }
 0x219   : > { %v956_v42 = vpop.f32.mrf.mxu0  ;;  %v985_v54 = vpop.f32.mrf.mxu1 }
 0x21a   : > { %v997_v6 = vadd.f32 %v956_v42, %v888_v11  ;;  %v998_v14 = vadd.f32 %v985_v54, %v889_v21  ;;  %v587_v42 = vadd.f32 %v549_v37, %v445_v61 }
 0x21e   : > { %v850_v9 = vpop.f32.mrf.mxu2  ;;  %v879_v10 = vpop.f32.mrf.mxu3 }
 0x21f   : > { %v890_v7 = vadd.f32 %v850_v9, %v781_v27  ;;  %v891_v60 = vadd.f32 %v879_v10, %v3428_v12  ;;  %v588_v12 = vadd.f32 %v3393_v49, %v474_v18  ;;  %v4395_v10 = vmov 0.0  }
 0x221   : > { %v959_v15 = vpop.f32.mrf.mxu0  ;;  %v988_v16 = vpop.f32.mrf.mxu1 }
 0x222   : > { %v999_v54 = vadd.f32 %v959_v15, %v890_v7  ;;  %v1000_v41 = vadd.f32 %v988_v16, %v891_v60  ;;  %v698_v15 = vadd.f32 %v3449_v56, %v587_v42 }
 0x224   : > { %v785_v61 = vadd.f32 %v3453_v58, %v698_v15  ;;  %v4400_v58 = vld [vmem:[#allocation5_spill] sm:$0xff] }
 0x226   : > { %v853_v22 = vpop.f32.mrf.mxu2  ;;  %v882_v23 = vpop.f32.mrf.mxu3 }
 0x227   : > { %v893_v49 = vadd.f32 %v882_v23, %v3440_v24 }
 0x229   : > { %v3461_v46 = vpop.f32.mrf.mxu0  ;;  %v3463_v55 = vpop.f32.mrf.mxu1 }
 0x22e   : > { %v3467_v30 = vpop.f32.mrf.mxu2  ;;  %v3469_v48 = vpop.f32.mrf.mxu3 }
 0x22f   : > { %4394 = vst [vmem:[#allocation13_spill] sm:$0xff] %v3469_v48  ;;  %v894_v18 = vadd.f32 %v3467_v30, %v785_v61 }
 0x231   : > { %v3472_v2 = vpop.f32.mrf.mxu0  ;;  %v3474_v43 = vpop.f32.mrf.mxu1 }
 0x236   : > { %v1052_v5 = vpop.f32.mrf.mxu2  ;;  %v1081_v50 = vpop.f32.mrf.mxu3 }
 0x237   : > { %v1093_v19 = vadd.f32 %v1052_v5, %v997_v6  ;;  %v1094_v48 = vadd.f32 %v1081_v50, %v998_v14  ;;  %v699_v5 = vadd.f32 %v3451_v57, %v588_v12  ;;  %v1218_v50 = vpop.permute.xlu1 %1217  ;;  %v1002_v57 = vadd.f32 %v3463_v55, %v893_v49  ;;  %v4402_v12 = vld [vmem:[#allocation9_spill] sm:$0xff] }
 0x239   : > { %v1161_v29 = vpop.f32.mrf.mxu0  ;;  %v1190_v63 = vpop.f32.mrf.mxu1 }
 0x23a   : > { %v1202_v4 = vadd.f32 %v1161_v29, %v1093_v19  ;;  %v1203_v53 = vadd.f32 %v1190_v63, %v1094_v48  ;;  %v783_v19 = vadd.f32 %v3447_v52, %v696_v47 }
 0x23c   : > { %v1230_v31 = vadd.f32 %v1213_v34, %v1202_v4  ;;  %v1231_v40 = vadd.f32 %v1213_v34, %v1203_v53  ;;  %v892_v16 = vadd.f32 %v853_v22, %v783_v19  ;;  %v786_v4 = vadd.f32 %v3455_v62, %v699_v5 }
 0x23e   : > { %v3481_v45 = vmax.f32 %v1230_v31, 0.0  ;;  %v3483_v28 = vmax.f32 %v1231_v40, 0.0  ;;  %v1055_v39 = vpop.f32.mrf.mxu2  ;;  %v1084_v35 = vpop.f32.mrf.mxu3 }
 0x23f   : > { %v1095_v36 = vadd.f32 %v1055_v39, %v999_v54  ;;  %v1096_v9 = vadd.f32 %v1084_v35, %v1000_v41  ;;  %v1223_v31 = vpop.permute.xlu2 %1222  ;;  %v4401_v54 = vld [vmem:[#allocation13_spill] sm:$0xff] }
 0x240   : > { %v2600_v44 = vpack.i.bf16 %v3481_v45, %v4395_v10  ;;  %v1348_v13 = vmul.f32 %v3483_v28, %v3192_v1  ;;  %v1254_v37 = vmul.f32 %v3481_v45, %v3103_v25  ;;  %v1339_v51 = vmul.f32 %v3481_v45, %v3118_v33 }
 0x241   : > { %v1164_v52 = vpop.f32.mrf.mxu0  ;;  %v1193_v48 = vpop.f32.mrf.mxu1  ;;  %v1340_v11 = vmul.f32 %v3112_v32, %v3483_v28  ;;  %v3505_v24 = vmul.f32 %v3196_v3, %v3481_v45  ;;  %v3509_v22 = vmul.f32 %v3483_v28, %v3212_v8  ;;  %v3523_v38 = vmul.f32 %v3086_v17, %v3483_v28 }
 0x242   : > { %v1204_v21 = vadd.f32 %v1164_v52, %v1095_v36  ;;  %v1205_v59 = vadd.f32 %v1193_v48, %v1096_v9  ;;  %2601 = vrot.lane.b32.xlu2 %v2600_v44, %s2978_s13  ;;  %v2610_v6 = vpack.i.bf16 %v3188_v0, %v1348_v13  ;;  %v2605_v14 = vpack.i.bf16 %v1254_v37, %v3105_v26  ;;  %v4403_v44 = vld [vmem:[#allocation10_spill] sm:$0xff] }
 0x243   : > { %v2615_v56 = vpack.i.bf16 %v1340_v11, %v1339_v51  ;;  %4396 = vst [vmem:[#allocation14_spill] sm:$0xff] %v3505_v24  ;;  %v3515_v26 = vmul.f32 %v3481_v45, %v3092_v20  ;;  %v1001_v0 = vadd.f32 %v3461_v46, %v892_v16  ;;  %v1255_v42 = vmul.f32 %v4400_v58, %v3483_v28 }
 0x244   : > { %4397 = vst [vmem:[#allocation15_spill] sm:$0xff] %v3509_v22  ;;  %v1232_v23 = vadd.f32 %v1218_v50, %v1204_v21  ;;  %v1233_v27 = vadd.f32 %v1218_v50, %v1205_v59  ;;  %2611 = vrot.lane.b32.xlu0 %v2610_v6, %s2984_s7  ;;  %2606 = vrot.lane.b32.xlu1 %v2605_v14, %s2984_s7 }
 0x245   : > { %4398 = vst [vmem:[#allocation16_spill] sm:$0xff] %v3515_v26  ;;  %v895_v41 = vadd.f32 %v4401_v54, %v786_v4  ;;  %v3551_v19 = vmul.f32 %v4402_v12, %v3481_v45  ;;  %v1003_v11 = vadd.f32 %v3472_v2, %v894_v18 }
 0x246   : > { %4399 = vst [vmem:[#allocation17_spill] sm:$0xff] %v3523_v38  ;;  %v3526_v7 = vmax.f32 %v1232_v23, 0.0  ;;  %v3528_v60 = vmax.f32 %v1233_v27, 0.0  ;;  %v1058_v29 = vpop.f32.mrf.mxu2  ;;  %v1087_v63 = vpop.f32.mrf.mxu3 }
 0x247   : > { %v1097_v46 = vadd.f32 %v1058_v29, %v1001_v0  ;;  %v1098_v53 = vadd.f32 %v1087_v63, %v1002_v57  ;;  %v1004_v21 = vadd.f32 %v3474_v43, %v895_v41 }
 0x248   : > { %v2620_v40 = vpack.i.bf16 %v3526_v7, %v3483_v28  ;;  %v1256_v47 = vmul.f32 %v3526_v7, %v3103_v25  ;;  %v3543_v35 = vmul.f32 %v3526_v7, %v3118_v33  ;;  %v3547_v30 = vmul.f32 %v3112_v32, %v3528_v60 }
 0x249   : > { %v1167_v62 = vpop.f32.mrf.mxu0  ;;  %v1196_v39 = vpop.f32.mrf.mxu1  ;;  %v3555_v13 = vmul.f32 %v3528_v60, %v4403_v44  ;;  %v3561_v51 = vmul.f32 %v3196_v3, %v3526_v7  ;;  %v3565_v15 = vmul.f32 %v3528_v60, %v3212_v8  ;;  %v3569_v16 = vmul.f32 %v3526_v7, %v3092_v20 }
 0x24a   : > { %v1206_v36 = vadd.f32 %v1167_v62, %v1097_v46  ;;  %v1207_v9 = vadd.f32 %v1196_v39, %v1098_v53  ;;  %v2625_v10 = vpack.i.bf16 %v1256_v47, %v1255_v42  ;;  %v2670_v37 = vpack.i.bf16 %v3547_v30, %v3543_v35 }
 0x24b   : > { %v3582_v6 = vmul.f32 %v3086_v17, %v3528_v60  ;;  %v1257_v2 = vmul.f32 %v4400_v58, %v3528_v60  ;;  %v1350_v61 = vmul.f32 %v3528_v60, %v3192_v1  ;;  %v3597_v18 = vmul.f32 %v4402_v12, %v3526_v7 }
 0x24c   : > { %v1234_v49 = vadd.f32 %v1223_v31, %v1206_v36  ;;  %v1235_v52 = vadd.f32 %v1223_v31, %v1207_v9  ;;  %2616 = vrot.lane.b32.xlu1 %v2615_v56, %s2981_s16  ;;  %2621 = vrot.lane.b32.xlu0 %v2620_v40, %s2978_s13 }
 0x24d   : > { %2626 = vrot.lane.b32.xlu2 %v2625_v10, %s2984_s7 }
 0x24e   : > { %v1242_v14 = vmax.f32 %v1234_v49, 0.0  ;;  %v1243_v5 = vmax.f32 %v1235_v52, 0.0  ;;  %v1061_v50 = vpop.f32.mrf.mxu2  ;;  %v1090_v56 = vpop.f32.mrf.mxu3  ;;  %v4406_v49 = vld [vmem:[#allocation7_spill] sm:$0xff] }
 0x24f   : > { %v1099_v23 = vadd.f32 %v1061_v50, %v1003_v11  ;;  %v1100_v27 = vadd.f32 %v1090_v56, %v1004_v21  ;;  %v1347_v52 = vmul.f32 %v4406_v49, %v3481_v45 }
 0x250   : > { %v2630_v0 = vpack.i.bf16 %v1242_v14, %v3528_v60  ;;  %v1258_v57 = vmul.f32 %v1242_v14, %v3103_v25  ;;  %v1352_v29 = vmul.f32 %v1243_v5, %v3192_v1  ;;  %v1343_v46 = vmul.f32 %v1242_v14, %v3118_v33  ;;  %v1228_v60 = vpop.permute.xlu1 %1227 }
 0x251   : > { %v1170_v63 = vpop.f32.mrf.mxu0  ;;  %v1199_v4 = vpop.f32.mrf.mxu1  ;;  %v1344_v53 = vmul.f32 %v3112_v32, %v1243_v5  ;;  %v3600_v31 = vmul.f32 %v1243_v5, %v4403_v44  ;;  %v3605_v39 = vmul.f32 %v3196_v3, %v1242_v14  ;;  %v3610_v10 = vmul.f32 %v1243_v5, %v3212_v8 }
 0x252   : > { %v1208_v40 = vadd.f32 %v1170_v63, %v1099_v23  ;;  %v1209_v42 = vadd.f32 %v1199_v4, %v1100_v27  ;;  %v2635_v47 = vpack.i.bf16 %v1258_v57, %v1257_v2  ;;  %v2640_v54 = vpack.i.bf16 %v1350_v61, %v1352_v29 }
 0x253   : > { %v2675_v41 = vpack.i.bf16 %v1344_v53, %v1343_v46  ;;  %4404 = vst [vmem:[#allocation5_spill] sm:$0xff] %v3605_v39  ;;  %v3615_v11 = vmul.f32 %v1242_v14, %v3092_v20  ;;  %v3618_v21 = vmul.f32 %v3086_v17, %v1243_v5  ;;  %v1349_v23 = vmul.f32 %v4406_v49, %v3526_v7 }
 0x254   : > { %v1236_v36 = vadd.f32 %v1228_v60, %v1208_v40  ;;  %v1237_v9 = vadd.f32 %v1228_v60, %v1209_v42  ;;  %2631 = vrot.lane.b32.xlu1 %v2630_v0, %s2978_s13  ;;  %2636 = vrot.lane.b32.xlu0 %v2635_v47, %s2984_s7  ;;  %4405 = vst [vmem:[#allocation13_spill] sm:$0xff] %v3610_v10 }
 0x255   : > { %4407 = vst [vmem:[#allocation9_spill] sm:$0xff] %v3615_v11  ;;  %v1259_v2 = vmul.f32 %v4400_v58, %v1243_v5  ;;  %v1351_v0 = vmul.f32 %v4406_v49, %v1242_v14  ;;  %v3629_v45 = vmul.f32 %v4402_v12, %v1242_v14 }
 0x256   : > { %4408 = vst [vmem:[#allocation10_spill] sm:$0xff] %v3618_v21  ;;  %v3620_v50 = vmax.f32 %v1236_v36, 0.0  ;;  %v1245_v56 = vmax.f32 %v1237_v9, 0.0 }
 0x258   : > { %v2645_v61 = vpack.i.bf16 %v3620_v50, %v1243_v5  ;;  %v1260_v29 = vmul.f32 %v3620_v50, %v3103_v25  ;;  %v1261_v7 = vmul.f32 %v4400_v58, %v1245_v56  ;;  %v1353_v63 = vmul.f32 %v4406_v49, %v3620_v50 }
 0x259   : > { %v1354_v4 = vmul.f32 %v1245_v56, %v3192_v1  ;;  %v1345_v46 = vmul.f32 %v3620_v50, %v3118_v33  ;;  %v1346_v14 = vmul.f32 %v3112_v32, %v1245_v56  ;;  %v3644_v53 = vmul.f32 %v1245_v56, %v4403_v44 }
 0x25a   : > { %2646 = vrot.lane.b32.xlu2 %v2645_v61, %s2978_s13  ;;  %v2650_v5 = vpack.i.bf16 %v1260_v29, %v1259_v2  ;;  %v2655_v40 = vpack.i.bf16 %v1347_v52, %v1261_v7  ;;  %v2660_v25 = vpack.i.bf16 %v1353_v63, %v1349_v23  ;;  %v3651_v1 = vmul.f32 %v3196_v3, %v3620_v50 }
 0x25b   : > { %v2665_v42 = vpack.i.bf16 %v1351_v0, %v1354_v4  ;;  %v2680_v58 = vpack.i.bf16 %v1346_v14, %v1345_v46  ;;  %v3656_v32 = vmul.f32 %v1245_v56, %v3212_v8  ;;  %v3660_v33 = vmul.f32 %v3620_v50, %v3092_v20 }
 0x25c   : > { %2641 = vrot.lane.b32.xlu0 %v2640_v54, %s2984_s7  ;;  %2651 = vrot.lane.b32.xlu1 %v2650_v5, %s2984_s7  ;;  %v3663_v60 = vmul.f32 %v3086_v17, %v1245_v56 }
 0x25d   : > { %4409 = vst [vmem:[#allocation7_spill] sm:$0xff] %v3660_v33 }
 0x262   : > { %2656 = vrot.lane.b32.xlu2 %v2655_v40, %s2984_s7 }
 0x264   : > { %1286 = vrot.lane.b32.xlu0 %v1245_v56, %s2978_s13  ;;  %2661 = vrot.lane.b32.xlu1 %v2660_v25, %s2984_s7 }
 0x26a   : > { %2666 = vrot.lane.b32.xlu2 %v2665_v42, %s2984_s7 }
 0x26c   : > { %2676 = vrot.lane.b32.xlu0 %v2675_v41, %s2981_s16  ;;  %2681 = vrot.lane.b32.xlu1 %v2680_v58, %s2981_s16 }
 0x272   : > { %2671 = vrot.lane.b32.xlu2 %v2670_v37, %s2981_s16 }
 0x29c   : > { %v2602_v17 = vpop.permute.xlu2 %2601 }
 0x29d   : > { %v2604_v0 = vunpack.i.h.bf16 %v2602_v17  ;;  %v3696_v29 = vunpack.i.l.bf16 %v2602_v17 }
 0x2a7   : > { %v2627_v20 = vpop.permute.xlu2 %2626 }
 0x2a8   : > { %v2629_v49 = vunpack.i.h.bf16 %v2627_v20  ;;  %v2628_v52 = vunpack.i.l.bf16 %v2627_v20 }
 0x2b4   : > { %v2647_v8 = vpop.permute.xlu2 %2646 }
 0x2b5   : > { %v3717_v17 = vunpack.i.l.bf16 %v2647_v8 }
 0x2b6   : > { %v2612_v54 = vpop.permute.xlu0 %2611  ;;  %v3679_v9 = vpop.permute.xlu1 %2606 }
 0x2b7   : > { %v4373_v56 = vunpack.i.h.bf16 %v3679_v9  ;;  %v3683_v41 = vunpack.i.l.bf16 %v3679_v9  ;;  %v2614_v40 = vunpack.i.h.bf16 %v2612_v54  ;;  %v2613_v25 = vunpack.i.l.bf16 %v2612_v54 }
 0x2b9   : > { %v3687_v23 = vsel %vm1322_vm14, %v3683_v41, %v2629_v49  ;;  %v1324_v35 = vsel %vm1322_vm14, %v4373_v56, %v2628_v52  ;;  %v1382_v57 = vsel %vm1322_vm14, %v2613_v25, %v2614_v40 }
 0x2ba   : > { %v3692_v30 = vpack.i.bf16 %v2628_v52, %v1324_v35 }
 0x2bc   : > { %v3698_v7 = vpop.permute.xlu2 %2656 }
 0x2bd   : > { %v2659_v14 = vunpack.i.h.bf16 %v3698_v7  ;;  %v4374_v43 = vunpack.i.l.bf16 %v3698_v7 }
 0x2be   : > { %v2622_v37 = vpop.permute.xlu0 %2621  ;;  %v3694_v2 = vpop.permute.xlu1 %2616 }
 0x2bf   : > { %v2623_v61 = vunpack.i.l.bf16 %v2622_v37  ;;  %v1381_v35 = vsel %vm1322_vm14, %v2659_v14, %v2613_v25 }
 0x2c0   : > { %v2690_v3 = vpack.i.bf16 %v1382_v57, %v1381_v35  ;;  %v3753_v57 = vsel %vm593_vm6, %v3696_v29, %v2604_v0 }
 0x2c1   : > { %v3701_v63 = vsel %vm593_vm6, %v2604_v0, %v2623_v61  ;;  %v3708_v46 = vsel %vm593_vm6, %v2623_v61, %v3696_v29 }
 0x2c2   : > { %v3704_v4 = vpack.i.bf16 %v2623_v61, %v3701_v63  ;;  %v3721_v61 = vunpack.i.h.bf16 %v2622_v37 }
 0x2c4   : > { %2686 = vrot.lane.b32.xlu1 %v3704_v4, %s2981_s16  ;;  %v2667_v48 = vpop.permute.xlu2 %2666 }
 0x2c5   : > { %v2669_v35 = vunpack.i.h.bf16 %v2667_v48  ;;  %v2668_v39 = vunpack.i.l.bf16 %v2667_v48 }
 0x2c6   : > { %v3715_v42 = vpop.permute.xlu0 %2636  ;;  %v2632_v58 = vpop.permute.xlu1 %2631 }
 0x2c7   : > { %v4372_v20 = vunpack.i.l.bf16 %v3715_v42  ;;  %v2634_v52 = vunpack.i.h.bf16 %v2632_v58  ;;  %v3723_v55 = vunpack.i.l.bf16 %v2632_v58  ;;  %v2649_v58 = vunpack.i.h.bf16 %v2647_v8 }
 0x2c8   : > { %v1388_v26 = vsel %vm1322_vm14, %v2668_v39, %v2614_v40 }
 0x2c9   : > { %v3728_v34 = vsel %vm593_vm6, %v2634_v52, %v3717_v17  ;;  %v3733_v54 = vsel %vm1322_vm14, %v2629_v49, %v4372_v20  ;;  %v2695_v27 = vpack.i.bf16 %v2604_v0, %v3723_v55  ;;  %v3739_v37 = vsel %vm593_vm6, %v3721_v61, %v3723_v55 }
 0x2ca   : > { %v2700_v25 = vpack.i.bf16 %v3739_v37, %v3721_v61  ;;  %v3749_v49 = vpack.i.bf16 %v3717_v17, %v3728_v34  ;;  %v2745_v10 = vpack.i.bf16 %v2669_v35, %v1388_v26  ;;  %v4411_v26 = vpack.i.bf16 %v3629_v45, %v3644_v53 }
 0x2cb   : > { %2696 = vrot.lane.b32.xlu0 %v2695_v27, %s2981_s16  ;;  %v4415_v45 = vpack.i.bf16 %v3551_v19, %v3555_v13  ;;  %v4416_v53 = vunpack.i.l.bf16 %v3698_v7 }
 0x2cc   : > { %2691 = vrot.lane.b32.xlu1 %v2690_v3, %s2981_s16  ;;  %2701 = vrot.lane.b32.xlu2 %v2700_v25, %s2981_s16  ;;  %v3861_v13 = vpop.permute.xlu2 %2671 }
 0x2ce   : > { %v2642_v36 = vpop.permute.xlu0 %2641  ;;  %v2652_v27 = vpop.permute.xlu1 %2651 }
 0x2cf   : > { %v2644_v5 = vunpack.i.h.bf16 %v2642_v36  ;;  %v2654_v3 = vunpack.i.h.bf16 %v2652_v27  ;;  %v2643_v56 = vunpack.i.l.bf16 %v2642_v36  ;;  %v3778_v36 = vsel %vm593_vm6, %v3696_v29, %v2649_v58 }
 0x2d1   : > { %v1384_v59 = vsel %vm1322_vm14, %v2644_v5, %v2614_v40  ;;  %v3762_v0 = vsel %vm1322_vm14, %v3683_v41, %v2654_v3  ;;  %v3767_v25 = vsel %vm1322_vm14, %v2654_v3, %v4374_v43  ;;  %v3782_v3 = vsel %vm593_vm6, %v3696_v29, %v2634_v52 }
 0x2d2   : > { %v2710_v20 = vpack.i.bf16 %v2659_v14, %v1384_v59  ;;  %v1385_v47 = vsel %vm1322_vm14, %v2669_v35, %v2643_v56  ;;  %v1386_v8 = vsel %vm1322_vm14, %v2643_v56, %v2614_v40 }
 0x2d3   : > { %v2720_v22 = vpack.i.bf16 %v1386_v8, %v1385_v47 }
 0x2d4   : > { %2716 = vrot.lane.b32.xlu1 %v3749_v49, %s2981_s16  ;;  %2711 = vrot.lane.b32.xlu0 %v2710_v20, %s2981_s16 }
 0x2d6   : > { %v3774_v59 = vpop.permute.xlu0 %1286  ;;  %v2662_v14 = vpop.permute.xlu1 %2661 }
 0x2d7   : > { %v3786_v43 = vsel %vm593_vm6, %v2649_v58, %v3774_v59  ;;  %v2663_v20 = vunpack.i.l.bf16 %v2662_v14  ;;  %v3793_v62 = vsel %vm593_vm6, %v3774_v59, %v3696_v29  ;;  %v2725_v56 = vpack.i.bf16 %v2634_v52, %v3774_v59 }
 0x2d8   : > { %v2800_v21 = vpack.i.bf16 %v3793_v62, %v3786_v43  ;;  %v2730_v38 = vpack.i.bf16 %v3786_v43, %v2649_v58  ;;  %v2664_v33 = vunpack.i.h.bf16 %v2662_v14  ;;  %v1860_v58 = vmul.f32 %v3483_v28, %v4403_v44 }
 0x2d9   : > { %v1383_v11 = vsel %vm1322_vm14, %v2663_v20, %v2644_v5  ;;  %v2653_v5 = vunpack.i.l.bf16 %v2652_v27  ;;  %v1868_v44 = vsel %vm593_vm6, %v3723_v55, %v3696_v29  ;;  %v4422_v62 = vpack.i.bf16 %v3782_v3, %v3774_v59  ;;  %v4429_v59 = vld [vmem:[#allocation13_spill] sm:$0xff]  ;;  %v4435_v3 = vld [vmem:[#allocation10_spill] sm:$0xff] }
 0x2da   : > { %v2705_v24 = vpack.i.bf16 %v1383_v11, %v2663_v20  ;;  %v4410_v11 = vpack.i.bf16 %v3597_v18, %v3600_v31  ;;  %v1387_v48 = vsel %vm1322_vm14, %v2664_v33, %v2668_v39  ;;  %v4412_v18 = vunpack.i.h.bf16 %v3679_v9 }
 0x2db   : > { %v2735_v40 = vpack.i.bf16 %v1387_v48, %v2664_v33  ;;  %v4413_v39 = vunpack.i.l.bf16 %v3715_v42  ;;  %v4414_v33 = vld [vmem:[#allocation11_spill] sm:$0xff] }
 0x2dc   : > { %2721 = vrot.lane.b32.xlu1 %v2720_v22, %s2981_s16  ;;  %2706 = vrot.lane.b32.xlu2 %v2705_v24, %s2981_s16  ;;  %v2639_v22 = vunpack.i.h.bf16 %v3715_v42  ;;  %v1323_v31 = vsel %vm1322_vm14, %v3683_v41, %v4412_v18  ;;  %v2825_v42 = vpack.i.bf16 %v1868_v44, %v3739_v37 }
 0x2dd   : > { %2726 = vrot.lane.b32.xlu0 %v2725_v56, %s2981_s16 }
 0x2de   : > { %v1328_v24 = vsel %vm1322_vm14, %v2639_v22, %v2653_v5  ;;  %v1327_v28 = vsel %vm1322_vm14, %v3683_v41, %v2639_v22  ;;  %v3863_v41 = vpop.permute.xlu1 %2681 }
 0x2df   : > { %v2780_v47 = vpack.i.bf16 %v2653_v5, %v1328_v24  ;;  %v2770_v9 = vpack.i.bf16 %v1327_v28, %v4416_v53 }
 0x2e4   : > { %2756 = vrot.lane.b32.xlu1 %v4410_v11, %s2984_s7  ;;  %2731 = vrot.lane.b32.xlu2 %v2730_v38, %s2981_s16  ;;  %v1865_v38 = vmul.f32 %v4402_v12, %v3620_v50  ;;  %v1869_v12 = vsel %vm593_vm6, %v3717_v17, %v3696_v29  ;;  %v3867_v17 = vpop.permute.xlu0 %2676 }
 0x2e5   : > { %2746 = vrot.lane.b32.xlu0 %v2745_v10, %s2981_s16  ;;  %v2795_v10 = vpack.i.bf16 %v1323_v31, %v4413_v39  ;;  %v2810_v50 = vpack.i.bf16 %v1869_v12, %v3728_v34  ;;  %v1290_v34 = vsel %vm593_vm6, %v3696_v29, %v3721_v61 }
 0x2e6   : > { %v2740_v52 = vpack.i.bf16 %v1865_v38, %v4414_v33  ;;  %v2840_v19 = vpack.i.bf16 %v3739_v37, %v1290_v34 }
 0x2ec   : > { %2781 = vrot.lane.b32.xlu1 %v2780_v47, %s2979_s14  ;;  %2736 = vrot.lane.b32.xlu2 %v2735_v40, %s2981_s16 }
 0x2ed   : > { %2751 = vrot.lane.b32.xlu0 %v4411_v26, %s2984_s7 }
 0x2f4   : > { %2741 = vrot.lane.b32.xlu2 %v2740_v52, %s2984_s7  ;;  %2796 = vrot.lane.b32.xlu1 %v2795_v10, %s2979_s14 }
 0x2f5   : > { %1881 = vrot.lane.b32.xlu0 %v1860_v58, %s2984_s7 }
 0x2fc   : > { %2761 = vrot.lane.b32.xlu2 %v4415_v45, %s2984_s7  ;;  %2811 = vrot.lane.b32.xlu1 %v2810_v50, %s2976_s11 }
 0x304   : > { %2771 = vrot.lane.b32.xlu2 %v2770_v9, %s2979_s14  ;;  %2826 = vrot.lane.b32.xlu1 %v2825_v42, %s2976_s11 }
 0x30c   : > { %2841 = vrot.lane.b32.xlu1 %v2840_v19, %s2979_s14 }
 0x326   : > { %v3865_v7 = vpop.permute.xlu2 %2701 }
 0x336   : > { %v3869_v35 = vpop.permute.xlu1 %2686  ;;  %v2707_v27 = vpop.permute.xlu2 %2706 }
 0x337   : > { %v2709_v40 = vunpack.i.h.bf16 %v2707_v27  ;;  %v2708_v38 = vunpack.i.l.bf16 %v2707_v27 }
 0x33d   : > { %v3871_v8 = vpop.permute.xlu0 %2696 }
 0x33e   : > { %v2692_v14 = vpop.permute.xlu1 %2691  ;;  %v3873_v20 = vpop.permute.xlu2 %2731 }
 0x33f   : > { %v2693_v27 = vunpack.i.l.bf16 %v2692_v14 }
 0x346   : > { %v3875_v61 = vpop.permute.xlu1 %2716  ;;  %v2712_v37 = vpop.permute.xlu0 %2711 }
 0x347   : > { %v2737_v56 = vpop.permute.xlu2 %2736  ;;  %v2714_v44 = vunpack.i.h.bf16 %v2712_v37  ;;  %v2713_v34 = vunpack.i.l.bf16 %v2712_v37 }
 0x348   : > { %v2739_v5 = vunpack.i.h.bf16 %v2737_v56  ;;  %v2738_v11 = vunpack.i.l.bf16 %v2737_v56  ;;  %v2734_v56 = vunpack.i.h.bf16 %v3873_v20 }
 0x349   : > { %v1486_v37 = vsel %vm615_vm12, %v2714_v44, %v2693_v27 }
 0x34a   : > { %v1492_v22 = vsel %vm615_vm12, %v2738_v11, %v2739_v5  ;;  %v2733_v11 = vunpack.i.l.bf16 %v3873_v20  ;;  %v1489_v20 = vsel %vm615_vm12, %v2709_v40, %v2713_v34  ;;  %v2688_v34 = vunpack.i.l.bf16 %v3869_v35 }
 0x34b   : > { %1547 = vmatpush.msra.mxu2 %v1492_v22  ;;  %v1488_v22 = vsel %vm615_vm12, %v2708_v38, %v2709_v40 }
 0x34e   : > { %v2722_v24 = vpop.permute.xlu1 %2721 }
 0x34f   : > { %v2742_v48 = vpop.permute.xlu2 %2741  ;;  %v2727_v47 = vpop.permute.xlu0 %2726  ;;  %v2723_v52 = vunpack.i.l.bf16 %v2722_v24  ;;  %v2724_v45 = vunpack.i.h.bf16 %v2722_v24  ;;  %v2694_v24 = vunpack.i.h.bf16 %v2692_v14  ;;  %v2718_v14 = vunpack.i.l.bf16 %v3875_v61 }
 0x350   : > { %v3880_v18 = vunpack.i.l.bf16 %v2742_v48  ;;  %v2744_v38 = vunpack.i.h.bf16 %v2742_v48  ;;  %v2698_v48 = vunpack.i.l.bf16 %v3871_v8 }
 0x351   : > { %v1487_v44 = vsel %vm615_vm12, %v2693_v27, %v2694_v24  ;;  %v2689_v27 = vunpack.i.h.bf16 %v3869_v35  ;;  %v2673_v24 = vunpack.i.l.bf16 %v3861_v13 }
 0x356   : > { %v3878_v26 = vpop.permute.xlu1 %2756 }
 0x357   : > { %v2759_v31 = vunpack.i.h.bf16 %v3878_v26  ;;  %v2758_v39 = vunpack.i.l.bf16 %v3878_v26  ;;  %v3884_v10 = vpop.permute.xlu2 %2761  ;;  %v2747_v33 = vpop.permute.xlu0 %2746  ;;  %v4436_v26 = vld [vmem:[#allocation9_spill] sm:$0xff] }
 0x358   : > { %v2763_v58 = vunpack.i.l.bf16 %v3884_v10  ;;  %v2749_v12 = vunpack.i.h.bf16 %v2747_v33  ;;  %v2748_v50 = vunpack.i.l.bf16 %v2747_v33  ;;  %v2729_v33 = vunpack.i.h.bf16 %v2727_v47 }
 0x359   : > { %v1902_v28 = vsel %vm1322_vm14, %v2758_v39, %v3880_v18 }
 0x35a   : > { %v1490_v53 = vsel %vm615_vm12, %v2749_v12, %v2723_v52  ;;  %v1493_v9 = vsel %vm615_vm12, %v2739_v5, %v2748_v50  ;;  %v1899_v42 = vsel %vm1322_vm14, %v2759_v31, %v2763_v58  ;;  %v1491_v5 = vsel %vm615_vm12, %v2723_v52, %v2724_v45 }
 0x35b   : > { %1548 = vmatpush.msra.mxu2 %v1490_v53  ;;  %1588 = vmatpush.msra.mxu3 %v1493_v9  ;;  %v2765_v19 = vpack.i.bf16 %v1899_v42, %v1902_v28  ;;  %v2704_v31 = vunpack.i.h.bf16 %v3865_v7  ;;  %v2703_v12 = vunpack.i.l.bf16 %v3865_v7  ;;  %v2728_v50 = vunpack.i.l.bf16 %v2727_v47 }
 0x35c   : > { %v1484_v52 = vsel %vm615_vm12, %v2733_v11, %v2734_v56  ;;  %v2719_v45 = vunpack.i.h.bf16 %v3875_v61  ;;  %v2699_v7 = vunpack.i.h.bf16 %v3871_v8  ;;  %v1482_v47 = vsel %vm615_vm12, %v2729_v33, %v2718_v14 }
 0x35d   : > { %2766 = vrot.lane.b32.xlu0 %v2765_v19, %s2976_s11  ;;  %1549 = vmatpush.msra.mxu2 %v1488_v22  ;;  %v1485_v9 = vsel %vm615_vm12, %v2734_v56, %v2728_v50  ;;  %v2683_v61 = vunpack.i.l.bf16 %v3863_v41  ;;  %v1480_v19 = vsel %vm615_vm12, %v2703_v12, %v2704_v31  ;;  %v2678_v8 = vunpack.i.l.bf16 %v3867_v17 }
 0x35e   : > { %1589 = vmatpush.msra.mxu3 %v1491_v5  ;;  %v1483_v11 = vsel %vm615_vm12, %v2718_v14, %v2719_v45  ;;  %v2764_v56 = vunpack.i.h.bf16 %v3884_v10  ;;  %v1478_v22 = vsel %vm615_vm12, %v2699_v7, %v2688_v34  ;;  %v2684_v5 = vunpack.i.h.bf16 %v3863_v41 }
 0x35f   : > { %v3904_v28 = vpop.permute.xlu0 %2751  ;;  %1550 = vmatpush.msra.mxu2 %v1486_v37  ;;  %v1481_v35 = vsel %vm615_vm12, %v2704_v31, %v2698_v48  ;;  %v1900_v37 = vsel %vm1322_vm14, %v2763_v58, %v3880_v18  ;;  %v2679_v41 = vunpack.i.h.bf16 %v3867_v17  ;;  %v1479_v31 = vsel %vm615_vm12, %v2688_v34, %v2689_v27  ;;  %v268_v34 = vld [vmem:[%s4354_s4 + $0x10] sm:$0xff]  ;;  %v2443_v27 = vld [vmem:[%s4353_s3 + $0x40] sm:$0xff] }
 0x360   : > { %v2753_v53 = vunpack.i.l.bf16 %v3904_v28  ;;  %1590 = vmatpush.msra.mxu3 %v1489_v20  ;;  %v4417_v20 = vld [vmem:[#allocation8_spill] sm:$0xff]  ;;  %v2618_v10 = vunpack.i.l.bf16 %v3694_v2  ;;  %v2674_v45 = vunpack.i.h.bf16 %v3861_v13  ;;  %v2619_v17 = vunpack.i.h.bf16 %v3694_v2 }
 0x361   : > { %1551 = vmatpush.msra.mxu2 %v1484_v52  ;;  %v1476_v14 = vsel %vm615_vm12, %v4417_v20, %v2683_v61  ;;  %v1474_v58 = vsel %vm615_vm12, %v4417_v20, %v2678_v8  ;;  %v1475_v7 = vsel %vm615_vm12, %v2678_v8, %v2679_v41  ;;  %v4418_v13 = vpack.i.bf16 %v3767_v25, %v3762_v0  ;;  %v2447_v41 = vld [vmem:[%s4353_s3 + $0x60] sm:$0xff] }
 0x362   : > { %1591 = vmatpush.msra.mxu3 %v1487_v44  ;;  %v1903_v40 = vsel %vm1322_vm14, %v2744_v38, %v2753_v53  ;;  %v1477_v44 = vsel %vm615_vm12, %v2683_v61, %v2684_v5  ;;  %v1471_v48 = vsel %vm615_vm12, %v2618_v10, %v2619_v17  ;;  %v4419_v2 = vpack.i.bf16 %v3733_v54, %v3687_v23 }
 0x363   : > { %1552 = vmatpush.msra.mxu2 %v1482_v47  ;;  %v2845_v42 = vpack.i.bf16 %v1903_v40, %v3880_v18  ;;  %v1470_v47 = vsel %vm615_vm12, %v4417_v20, %v2618_v10  ;;  %v1473_v40 = vsel %vm615_vm12, %v2673_v24, %v2674_v45  ;;  %v4420_v0 = vpack.i.bf16 %v3786_v43, %v3778_v36  ;;  %v4430_v36 = vld [vmem:[#allocation5_spill] sm:$0xff] }
 0x364   : > { %1592 = vmatpush.msra.mxu3 %v1485_v9  ;;  %v4421_v23 = vpack.i.bf16 %v3565_v15, %v3561_v51  ;;  %v2754_v54 = vunpack.i.h.bf16 %v3904_v28  ;;  %v4423_v43 = vpack.i.bf16 %v3582_v6, %v3569_v16  ;;  %v1904_v15 = vsel %vm1322_vm14, %v2753_v53, %v3880_v18  ;;  %v270_v16 = vld [vmem:[%s4354_s4 + $0x20] sm:$0xff]  ;;  %v4438_v28 = vld [vmem:[#allocation17_spill] sm:$0xff] }
 0x365   : > { %1553 = vmatpush.msra.mxu2 %v1480_v19  ;;  %2846 = vrot.lane.b32.xlu1 %v2845_v42, %s2976_s11  ;;  %v4425_v6 = vpack.i.bf16 %v3656_v32, %v3651_v1  ;;  %v4431_v1 = vpack.i.bf16 %v4429_v59, %v4430_v36  ;;  %v4432_v32 = vld [vmem:[#allocation15_spill] sm:$0xff]  ;;  %v4439_v53 = vld [vmem:[#allocation16_spill] sm:$0xff]  ;;  %v272_v19 = vld [vmem:[%s4354_s4 + $0x30] sm:$0xff] }
 0x366   : > { %1593 = vmatpush.msra.mxu3 %v1483_v11  ;;  %v1901_v51 = vsel %vm1322_vm14, %v2754_v54, %v2758_v39  ;;  %v2782_v39 = vpop.permute.xlu1 %2781  ;;  %v4440_v9 = vpack.i.bf16 %v4438_v28, %v4439_v53  ;;  %v269_v42 = vld [vmem:[%s4354_s4 + $0x18] sm:$0xff]  ;;  %v271_v11 = vld [vmem:[%s4354_s4 + $0x28] sm:$0xff] }
 0x367   : > { %v1882_v33 = vpop.permute.xlu0 %1881  ;;  %1554 = vmatpush.msra.mxu2 %v1478_v22  ;;  %v2444_v22 = vld [vmem:[%s4353_s3 + $0x48] sm:$0xff]  ;;  %v2783_v10 = vunpack.i.l.bf16 %v2782_v39 }
 0x368   : > { %v1898_v12 = vsel %vm1322_vm14, %v1882_v33, %v3880_v18  ;;  %v1897_v50 = vsel %vm1322_vm14, %v2764_v56, %v1882_v33  ;;  %1594 = vmatpush.msra.mxu3 %v1481_v35  ;;  %v4437_v18 = vpack.i.bf16 %v4435_v3, %v4436_v26  ;;  %v2772_v56 = vpop.permute.xlu2 %2771  ;;  %v2445_v33 = vld [vmem:[%s4353_s3 + $0x50] sm:$0xff] }
 0x369   : > { %v2785_v38 = vpack.i.bf16 %v3696_v29, %v1898_v12  ;;  %v2775_v52 = vpack.i.bf16 %v1897_v50, %v1900_v37  ;;  %1555 = vmatpush.msra.mxu2 %v1476_v14  ;;  %v1472_v29 = vsel %vm615_vm12, %v4417_v20, %v2673_v24  ;;  %v2446_v12 = vld [vmem:[%s4353_s3 + $0x58] sm:$0xff]  ;;  %v2774_v45 = vunpack.i.h.bf16 %v2772_v56 }
 0x36a   : > { %1595 = vmatpush.msra.mxu3 %v1479_v31  ;;  %v2784_v31 = vunpack.i.h.bf16 %v2782_v39 }
 0x36b   : > { %2776 = vrot.lane.b32.xlu0 %v2775_v52, %s2976_s11  ;;  %1556 = vmatpush.msra.mxu2 %v1474_v58 }
 0x36c   : > { %1596 = vmatpush.msra.mxu3 %v1477_v44  ;;  %2786 = vrot.lane.b32.xlu2 %v2785_v38, %s2976_s11  ;;  %v2773_v44 = vunpack.i.l.bf16 %v2772_v56 }
 0x36d   : > { %1557 = vmatpush.msra.mxu2 %v1472_v29  ;;  %2866 = vrot.lane.b32.xlu1 %v4418_v13, %s2979_s14 }
 0x36e   : > { %1597 = vmatpush.msra.mxu3 %v1475_v7  ;;  %v4049_v61 = vpop.permute.xlu1 %2796  ;;  %v2448_v7 = vld [vmem:[%s4353_s3 + $0x68] sm:$0xff] }
 0x36f   : > { %1558 = vmatpush.msra.mxu2 %v1470_v47 }
 0x370   : > { %1598 = vmatpush.msra.mxu3 %v1473_v40  ;;  %2451 = vmatmul.msk.f32.vlgmr.msra.gmra.mxu2 %vm1518_vm15, %v2443_v27  ;;  %v1717_v40 = vsel %vm399_vm10, %v2774_v45, %v2783_v10 }
 0x372   : > { %1599 = vmatpush.msra.mxu3 %v1471_v48  ;;  %v1718_v48 = vsel %vm399_vm10, %v2783_v10, %v2784_v31 }
 0x373   : > { %2791 = vrot.lane.b32.xlu0 %v4419_v2, %s2979_s14  ;;  %2459 = vmatmul.msk.f32.vlgmr.msra.gmra.mxu3 %vm1518_vm15, %v2443_v27 }
 0x374   : > { %2801 = vrot.lane.b32.xlu2 %v2800_v21, %s2976_s11  ;;  %v2850_v21 = vpack.i.bf16 %v1901_v51, %v1904_v15 }
 0x375   : > { %2871 = vrot.lane.b32.xlu1 %v3704_v4, %s2979_s14  ;;  %v4424_v4 = vpack.i.bf16 %v3708_v46, %v3701_v63  ;;  %v273_v63 = vld [vmem:[%s4354_s4 + $0x38] sm:$0xff] }
 0x376   : > { %v4427_v46 = vld [vmem:[#allocation7_spill] sm:$0xff]  ;;  %v4065_v8 = vpop.permute.xlu1 %2811 }
 0x377   : > { %v4428_v25 = vpack.i.bf16 %v3663_v60, %v4427_v46  ;;  %v266_v60 = vld [vmem:[%s4354_s4] sm:$0xff]  ;;  %v2449_v46 = vld [vmem:[%s4353_s3 + $0x70] sm:$0xff] }
 0x378   : > { %2452 = vmatmul.msk.f32.gmra.mxu2 %vm1518_vm15, %v2444_v22 }
 0x37b   : > { %2806 = vrot.lane.b32.xlu0 %v3692_v30, %s2979_s14  ;;  %v267_v30 = vld [vmem:[%s4354_s4 + $0x8] sm:$0xff]  ;;  %2460 = vmatmul.msk.f32.gmra.mxu3 %vm1518_vm15, %v2444_v22 }
 0x37c   : > { %2816 = vrot.lane.b32.xlu2 %v4420_v0, %s2979_s14  ;;  %v2798_v0 = vunpack.i.l.bf16 %v4049_v61 }
 0x37d   : > { %2886 = vrot.lane.b32.xlu1 %v4421_v23, %s2976_s11 }
 0x37e   : > { %v4072_v24 = vpop.permute.xlu1 %2826 }
 0x37f   : > { %v2829_v22 = vunpack.i.h.bf16 %v4072_v24 }
 0x380   : > { %2453 = vmatmul.msk.f32.gmra.mxu2 %vm1518_vm15, %v2445_v33 }
 0x383   : > { %2821 = vrot.lane.b32.xlu0 %v4422_v62, %s2979_s14  ;;  %2461 = vmatmul.msk.f32.gmra.mxu3 %vm1518_vm15, %v2445_v33  ;;  %v2828_v33 = vunpack.i.l.bf16 %v4072_v24 }
 0x384   : > { %2831 = vrot.lane.b32.xlu2 %v3749_v49, %s2979_s14  ;;  %v4426_v49 = vpack.i.bf16 %v3753_v57, %v3723_v55  ;;  %v4433_v55 = vld [vmem:[#allocation14_spill] sm:$0xff] }
 0x385   : > { %2901 = vrot.lane.b32.xlu1 %v4423_v43, %s2979_s14  ;;  %v4434_v57 = vpack.i.bf16 %v4432_v32, %v4433_v55  ;;  %v2799_v32 = vunpack.i.h.bf16 %v4049_v61  ;;  %v2814_v55 = vunpack.i.h.bf16 %v4065_v8  ;;  %v2813_v61 = vunpack.i.l.bf16 %v4065_v8 }
 0x386   : > { %v4083_v37 = vpop.permute.xlu1 %2841  ;;  %v1984_v31 = vsel %vm482_vm5, %v2828_v33, %v2829_v22 }
 0x388   : > { %2454 = vmatmul.msk.f32.gmra.mxu2 %vm1518_vm15, %v2446_v12 }
 0x38b   : > { %2836 = vrot.lane.b32.xlu0 %v4424_v4, %s2976_s11  ;;  %2462 = vmatmul.msk.f32.gmra.mxu3 %vm1518_vm15, %v2446_v12 }
 0x38c   : > { %2851 = vrot.lane.b32.xlu2 %v2850_v21, %s2976_s11 }
 0x38d   : > { %2151 = vperm.xlu1 %2598, %v267_v30  }
 0x390   : > { %2455 = vmatmul.msk.f32.gmra.mxu2 %vm1518_vm15, %v2447_v41 }
 0x393   : > { %2861 = vrot.lane.b32.xlu0 %v4425_v6, %s2976_s11  ;;  %2463 = vmatmul.msk.f32.gmra.mxu3 %vm1518_vm15, %v2447_v41  ;;  %v2843_v41 = vunpack.i.l.bf16 %v4083_v37 }
 0x394   : > { %2856 = vrot.lane.b32.xlu2 %v4426_v49, %s2979_s14 }
 0x395   : > { %2166 = vperm.xlu1 %2598, %v270_v16  }
 0x398   : > { %2456 = vmatmul.msk.f32.gmra.mxu2 %vm1518_vm15, %v2448_v7 }
 0x39b   : > { %2881 = vrot.lane.b32.xlu0 %v4428_v25, %s2979_s14  ;;  %2464 = vmatmul.msk.f32.gmra.mxu3 %vm1518_vm15, %v2448_v7 }
 0x39c   : > { %2876 = vrot.lane.b32.xlu2 %v4431_v1, %s2976_s11 }
 0x39d   : > { %2181 = vperm.xlu1 %2598, %v273_v63  }
 0x3a0   : > { %2457 = vmatmul.msk.f32.gmra.mxu2 %vm1518_vm15, %v2449_v46 }
 0x3a3   : > { %2896 = vrot.lane.b32.xlu0 %v4434_v57, %s2976_s11  ;;  %2465 = vmatmul.msk.f32.gmra.mxu3 %vm1518_vm15, %v2449_v46  ;;  %s2244_s11 = scalar_lea.hbm %s4355_s5, %s2513_s25 }
 0x3a4   : > { %2891 = vrot.lane.b32.xlu2 %v4437_v18, %s2979_s14  ;;  %s2247_s10 = sshll.u32 %s2244_s11, 4  ;;  %s2248_s10 = int_to_ptr.hbm [resolvable:$true] %s2247_s10 }
 0x3a5   : > { %s2924_s7 = sshra.s32 %s2248_s10, 4  ;;  %s2925_s7 = int_to_ptr.hbm [resolvable:$true] %s2924_s7 }
 0x3a6   : > { %s2926_s13 = scalar_lea.hbm %s2925_s7, 128  ;;  %p2931_p0 = scmp.lt.s32.totalorder %s2925_s7, %s4355_s5 }
 0x3a7   : > { %p2927_p11 = scmp.ne.s32.totalorder %s2925_s7, %s2926_s13  ;;  %p2932_p1 = scmp.lt.s32.totalorder %s2930_s8, %s2926_s13 }
 0x3a9   : > { %p2928_p12 = pnand %p2927_p11, %p3054_p5  ;;  %p2933_p2 = por %p2932_p1, %p2931_p0 }
 0x3ab   : > { %2146 = vperm.xlu0 %2597, %v266_v60   ;;  %p2929_p13 = pneg %p2928_p12 }
 0x3ac   : > { %2906 = vrot.lane.b32.xlu2 %v4440_v9, %s2979_s14 }
 0x3ad   : > { %p2934_p3 = pnand %p2933_p2, %p2929_p13 }
 0x3b3   : > { %2161 = vperm.xlu0 %2597, %v269_v42  }
 0x3b4   : > { %2156 = vperm.xlu2 %2599, %v268_v34  }
 0x3bb   : > { %2176 = vperm.xlu0 %2597, %v272_v19  }
 0x3bc   : > { %2171 = vperm.xlu2 %2599, %v271_v11  }
 0x3c6   : > { %v4074_v5 = vpop.permute.xlu2 %2786 }
 0x3c7   : > { %v2788_v57 = vunpack.i.l.bf16 %v4074_v5  ;;  %v2789_v34 = vunpack.i.h.bf16 %v4074_v5 }
 0x3c9   : > { %v1987_v24 = vsel %vm482_vm5, %v2814_v55, %v2789_v34  ;;  %v1985_v10 = vsel %vm482_vm5, %v2829_v22, %v2789_v34 }
 0x3ce   : > { %v4081_v35 = vpop.permute.xlu2 %2801 }
 0x3cf   : > { %v2767_v50 = vpop.permute.xlu0 %2766  ;;  %v2804_v3 = vunpack.i.h.bf16 %v4081_v35  ;;  %v2803_v26 = vunpack.i.l.bf16 %v4081_v35 }
 0x3d0   : > { %v2768_v16 = vunpack.i.l.bf16 %v2767_v50  ;;  %v2769_v25 = vunpack.i.h.bf16 %v2767_v50  ;;  %v2450_v50 = vld [vmem:[%s4353_s3 + $0x78] sm:$0xff] }
 0x3d1   : > { %v1988_v8 = vsel %vm482_vm5, %v2803_v26, %v2804_v3  ;;  %v1989_v5 = vsel %vm482_vm5, %v2804_v3, %v2789_v34  ;;  %2458 = vmatmul.msk.f32.gmra.mxu2 %vm1518_vm15, %v2450_v50  ;;  %2466 = vmatmul.msk.f32.gmra.mxu3 %vm1518_vm15, %v2450_v50 }
 0x3d6   : > { %v4090_v20 = vpop.permute.xlu2 %2816 }
 0x3d7   : > { %v2847_v14 = vpop.permute.xlu1 %2846  ;;  %v2819_v28 = vunpack.i.h.bf16 %v4090_v20  ;;  %v2818_v53 = vunpack.i.l.bf16 %v4090_v20  ;;  %v1986_v20 = vsel %vm482_vm5, %v2813_v61, %v2814_v55 }
 0x3d8   : > { %v2849_v43 = vunpack.i.h.bf16 %v2847_v14  ;;  %v2848_v51 = vunpack.i.l.bf16 %v2847_v14  ;;  %v2844_v14 = vunpack.i.h.bf16 %v4083_v37 }
 0x3d9   : > { %v1711_v12 = vsel %vm399_vm10, %v2818_v53, %v2819_v28 }
 0x3da   : > { %v1995_v1 = vsel %vm482_vm5, %v2768_v16, %v2848_v51  ;;  %v1991_v27 = vsel %vm482_vm5, %v2788_v57, %v2848_v51 }
 0x3dd   : > { %v4097_v38 = vpop.permute.xlu0 %2776 }
 0x3de   : > { %v4099_v52 = vpop.permute.xlu2 %2831  ;;  %v2778_v6 = vunpack.i.l.bf16 %v4097_v38  ;;  %v2779_v59 = vunpack.i.h.bf16 %v4097_v38 }
 0x3df   : > { %v2867_v58 = vpop.permute.xlu1 %2866  ;;  %v2833_v45 = vunpack.i.l.bf16 %v4099_v52 }
 0x3e0   : > { %v2869_v29 = vunpack.i.h.bf16 %v2867_v58  ;;  %v2868_v17 = vunpack.i.l.bf16 %v2867_v58  ;;  %v1992_v39 = vsel %vm482_vm5, %v2769_v25, %v2778_v6  ;;  %v1993_v60 = vsel %vm482_vm5, %v2778_v6, %v2848_v51 }
 0x3e1   : > { %v1990_v19 = vsel %vm482_vm5, %v2779_v59, %v2788_v57  ;;  %v2834_v58 = vunpack.i.h.bf16 %v4099_v52 }
 0x3e2   : > { %v1719_v13 = vsel %vm399_vm10, %v2868_v17, %v2869_v29  ;;  %v1720_v47 = vsel %vm399_vm10, %v2869_v29, %v2773_v44 }
 0x3e3   : > { %1773 = vmatpush.msra.mxu0 %v1719_v13  ;;  %1814 = vmatpush.msra.mxu1 %v1720_v47 }
 0x3e5   : > { %v2792_v2 = vpop.permute.xlu0 %2791  ;;  %1774 = vmatpush.msra.mxu0 %v1717_v40  ;;  %1815 = vmatpush.msra.mxu1 %v1718_v48 }
 0x3e6   : > { %v2852_v23 = vpop.permute.xlu2 %2851  ;;  %v2794_v54 = vunpack.i.h.bf16 %v2792_v2  ;;  %v2793_v62 = vunpack.i.l.bf16 %v2792_v2  ;;  %v1707_v2 = vsel %vm399_vm10, %v2843_v41, %v2844_v14 }
 0x3e7   : > { %v2854_v15 = vunpack.i.h.bf16 %v2852_v23  ;;  %v2853_v21 = vunpack.i.l.bf16 %v2852_v23  ;;  %v2872_v17 = vpop.permute.xlu1 %2871 }
 0x3e8   : > { %v1715_v30 = vsel %vm399_vm10, %v2793_v62, %v2794_v54  ;;  %v1716_v4 = vsel %vm399_vm10, %v2794_v54, %v2798_v0  ;;  %v2874_v40 = vunpack.i.h.bf16 %v2872_v17  ;;  %v2873_v48 = vunpack.i.l.bf16 %v2872_v17  ;;  %v2485_v17 = vld [vmem:[%s4353_s3 + $0x90] sm:$0xff] }
 0x3e9   : > { %1775 = vmatpush.msra.mxu0 %v1715_v30  ;;  %1816 = vmatpush.msra.mxu1 %v1716_v4  ;;  %v1996_v49 = vsel %vm482_vm5, %v2849_v43, %v2853_v21  ;;  %v1997_v63 = vsel %vm482_vm5, %v2853_v21, %v2848_v51  ;;  %v1994_v36 = vsel %vm482_vm5, %v2854_v15, %v2768_v16 }
 0x3ea   : > { %2050 = vmatpush.msrb.mxu2 %v1996_v49  ;;  %2091 = vmatpush.msrb.mxu3 %v1997_v63  ;;  %v1710_v0 = vsel %vm399_vm10, %v2833_v45, %v2834_v58  ;;  %v1706_v15 = vsel %vm399_vm10, %v2873_v48, %v2874_v40  ;;  %v1336_v40 = vld [vmem:[%s4353_s3 + $0x28] sm:$0xff] }
 0x3ec   : > { %2051 = vmatpush.msrb.mxu2 %v1994_v36  ;;  %2092 = vmatpush.msrb.mxu3 %v1995_v1 }
 0x3ed   : > { %v2807_v18 = vpop.permute.xlu0 %2806 }
 0x3ee   : > { %v2809_v9 = vunpack.i.h.bf16 %v2807_v18  ;;  %v2808_v42 = vunpack.i.l.bf16 %v2807_v18  ;;  %2052 = vmatpush.msrb.mxu2 %v1992_v39  ;;  %2093 = vmatpush.msrb.mxu3 %v1993_v60  ;;  %v2857_v35 = vpop.permute.xlu2 %2856 }
 0x3ef   : > { %v2859_v7 = vunpack.i.h.bf16 %v2857_v35  ;;  %v2858_v37 = vunpack.i.l.bf16 %v2857_v35  ;;  %v2887_v4 = vpop.permute.xlu1 %2886 }
 0x3f0   : > { %2053 = vmatpush.msrb.mxu2 %v1990_v19  ;;  %2094 = vmatpush.msrb.mxu3 %v1991_v27  ;;  %v1713_v11 = vsel %vm399_vm10, %v2799_v32, %v2808_v42  ;;  %v1714_v56 = vsel %vm399_vm10, %v2808_v42, %v2809_v9  ;;  %v2889_v59 = vunpack.i.h.bf16 %v2887_v4  ;;  %v2888_v36 = vunpack.i.l.bf16 %v2887_v4  ;;  %v4441_v32 = vld [vmem:[#allocation12_spill] sm:$0xff]  ;;  %v4442_v27 = vld [vmem:[#allocation6_spill] sm:$0xff] }
 0x3f1   : > { %1776 = vmatpush.msra.mxu0 %v1713_v11  ;;  %1817 = vmatpush.msra.mxu1 %v1714_v56  ;;  %v1705_v23 = vsel %vm399_vm10, %v2859_v7, %v2873_v48  ;;  %v1708_v54 = vsel %vm399_vm10, %v2844_v14, %v2858_v37  ;;  %v1334_v7 = vld [vmem:[%s4353_s3 + $0x18] sm:$0xff]  ;;  %v2488_v48 = vld [vmem:[%s4353_s3 + $0xa8] sm:$0xff] }
 0x3f2   : > { %2054 = vmatpush.msrb.mxu2 %v1988_v8  ;;  %2095 = vmatpush.msrb.mxu3 %v1989_v5  ;;  %v1976_v26 = vsel %vm482_vm5, %v2888_v36, %v2889_v59  ;;  %v1977_v18 = vsel %vm482_vm5, %v2889_v59, %v4441_v32  ;;  %v2486_v37 = vld [vmem:[%s4353_s3 + $0x98] sm:$0xff] }
 0x3f3   : > { %1777 = vmatpush.msra.mxu0 %v1711_v12 }
 0x3f4   : > { %2055 = vmatpush.msrb.mxu2 %v1986_v20  ;;  %2096 = vmatpush.msrb.mxu3 %v1987_v24  ;;  %v1331_v20 = vld [vmem:[%s4353_s3] sm:$0xff] }
 0x3f5   : > { %v2822_v38 = vpop.permute.xlu0 %2821 }
 0x3f6   : > { %v2824_v44 = vunpack.i.h.bf16 %v2822_v38  ;;  %v2823_v29 = vunpack.i.l.bf16 %v2822_v38  ;;  %2056 = vmatpush.msrb.mxu2 %v1984_v31  ;;  %2097 = vmatpush.msrb.mxu3 %v1985_v10  ;;  %v2877_v52 = vpop.permute.xlu2 %2876  ;;  %v2483_v31 = vld [vmem:[%s4353_s3 + $0x80] sm:$0xff] }
 0x3f7   : > { %v2879_v49 = vunpack.i.h.bf16 %v2877_v52  ;;  %v2878_v63 = vunpack.i.l.bf16 %v2877_v52  ;;  %v2902_v39 = vpop.permute.xlu1 %2901  ;;  %v1338_v52 = vld [vmem:[%s4353_s3 + $0x38] sm:$0xff] }
 0x3f8   : > { %v1709_v13 = vsel %vm399_vm10, %v2824_v44, %v2833_v45  ;;  %v1712_v47 = vsel %vm399_vm10, %v2819_v28, %v2823_v29  ;;  %v2903_v19 = vunpack.i.l.bf16 %v2902_v39  ;;  %v1332_v45 = vld [vmem:[%s4353_s3 + $0x8] sm:$0xff]  ;;  %v1333_v29 = vld [vmem:[%s4353_s3 + $0x10] sm:$0xff] }
 0x3f9   : > { %1778 = vmatpush.msra.mxu0 %v1709_v13  ;;  %1818 = vmatpush.msra.mxu1 %v1712_v47  ;;  %v1978_v57 = vsel %vm482_vm5, %v2878_v63, %v2879_v49  ;;  %v1979_v3 = vsel %vm482_vm5, %v2879_v49, %v4441_v32  ;;  %v2484_v44 = vld [vmem:[%s4353_s3 + $0x88] sm:$0xff]  ;;  %v1335_v13 = vld [vmem:[%s4353_s3 + $0x20] sm:$0xff] }
 0x3fa   : > { %v1699_v5 = vsel %vm399_vm10, %v4442_v27, %v2903_v19  ;;  %v2487_v47 = vld [vmem:[%s4353_s3 + $0xa0] sm:$0xff] }
 0x3fb   : > { %1779 = vmatpush.msra.mxu0 %v1707_v2  ;;  %1819 = vmatpush.msra.mxu1 %v1710_v0  ;;  %v1337_v2 = vld [vmem:[%s4353_s3 + $0x30] sm:$0xff] }
 0x3fc   : > { %v2489_v0 = vld [vmem:[%s4353_s3 + $0xb0] sm:$0xff] }
 0x3fd   : > { %v2837_v62 = vpop.permute.xlu0 %2836  ;;  %1780 = vmatpush.msra.mxu0 %v1705_v23  ;;  %1820 = vmatpush.msra.mxu1 %v1708_v54  ;;  %v1560_v23 = vpop.f32.mrf.mxu2 }
 0x3fe   : > { %v2839_v43 = vunpack.i.h.bf16 %v2837_v62  ;;  %v2838_v51 = vunpack.i.l.bf16 %v2837_v62  ;;  %v2892_v16 = vpop.permute.xlu2 %2891  ;;  %v1601_v54 = vpop.f32.mrf.mxu3  ;;  %v2490_v62 = vld [vmem:[%s4353_s3 + $0xb8] sm:$0xff] }
 0x3ff   : > { %1821 = vmatpush.msra.mxu1 %v1706_v15  ;;  %v2894_v28 = vunpack.i.h.bf16 %v2892_v16  ;;  %v2893_v53 = vunpack.i.l.bf16 %v2892_v16 }
 0x400   : > { %v1982_v21 = vsel %vm482_vm5, %v2838_v51, %v2839_v43  ;;  %v1983_v30 = vsel %vm482_vm5, %v2839_v43, %v2789_v34  ;;  %v2904_v34 = vunpack.i.h.bf16 %v2902_v39 }
 0x401   : > { %2057 = vmatpush.msrb.mxu2 %v1982_v21  ;;  %2098 = vmatpush.msrb.mxu3 %v1983_v30  ;;  %v1701_v35 = vsel %vm399_vm10, %v4442_v27, %v2893_v53  ;;  %v1702_v8 = vsel %vm399_vm10, %v2893_v53, %v2894_v28 }
 0x402   : > { %v1700_v12 = vsel %vm399_vm10, %v2903_v19, %v2904_v34 }
 0x405   : > { %v2862_v6 = vpop.permute.xlu0 %2861  ;;  %v1563_v43 = vpop.f32.mrf.mxu2 }
 0x406   : > { %v2864_v46 = vunpack.i.h.bf16 %v2862_v6  ;;  %v2863_v25 = vunpack.i.l.bf16 %v2862_v6  ;;  %v2907_v61 = vpop.permute.xlu2 %2906  ;;  %v1604_v51 = vpop.f32.mrf.mxu3 }
 0x407   : > { %v2909_v22 = vunpack.i.h.bf16 %v2907_v61  ;;  %v2908_v33 = vunpack.i.l.bf16 %v2907_v61 }
 0x408   : > { %v1980_v1 = vsel %vm482_vm5, %v2863_v25, %v2864_v46  ;;  %v1981_v55 = vsel %vm482_vm5, %v2864_v46, %v4441_v32 }
 0x409   : > { %2058 = vmatpush.msrb.mxu2 %v1980_v1  ;;  %2099 = vmatpush.msrb.mxu3 %v1981_v55  ;;  %v1697_v41 = vsel %vm399_vm10, %v4442_v27, %v2908_v33  ;;  %v1698_v38 = vsel %vm399_vm10, %v2908_v33, %v2909_v22 }
 0x40b   : > { %2059 = vmatpush.msrb.mxu2 %v1978_v57  ;;  %2100 = vmatpush.msrb.mxu3 %v1979_v3 }
 0x40d   : > { %v2882_v60 = vpop.permute.xlu0 %2881  ;;  %2060 = vmatpush.msrb.mxu2 %v1976_v26  ;;  %2101 = vmatpush.msrb.mxu3 %v1977_v18  ;;  %v1566_v15 = vpop.f32.mrf.mxu2 }
 0x40e   : > { %v2884_v9 = vunpack.i.h.bf16 %v2882_v60  ;;  %v2883_v42 = vunpack.i.l.bf16 %v2882_v60  ;;  %v1607_v21 = vpop.f32.mrf.mxu3 }
 0x410   : > { %v1703_v11 = vsel %vm399_vm10, %v4442_v27, %v2883_v42  ;;  %v1704_v56 = vsel %vm399_vm10, %v2883_v42, %v2884_v9 }
 0x411   : > { %1781 = vmatpush.msra.mxu0 %v1703_v11  ;;  %1822 = vmatpush.msra.mxu1 %v1704_v56 }
 0x413   : > { %1782 = vmatpush.msra.mxu0 %v1701_v35  ;;  %1823 = vmatpush.msra.mxu1 %v1702_v8 }
 0x415   : > { %v2897_v50 = vpop.permute.xlu0 %2896  ;;  %1783 = vmatpush.msra.mxu0 %v1699_v5  ;;  %1824 = vmatpush.msra.mxu1 %v1700_v12  ;;  %v1569_v30 = vpop.f32.mrf.mxu2 }
 0x416   : > { %v2899_v24 = vunpack.i.h.bf16 %v2897_v50  ;;  %v2898_v14 = vunpack.i.l.bf16 %v2897_v50  ;;  %v1610_v4 = vpop.f32.mrf.mxu3  ;;  %v2152_v5 = vpop.permute.xlu1 %2151 }
 0x417   : > { %1784 = vmatpush.msra.mxu0 %v1697_v41  ;;  %1825 = vmatpush.msra.mxu1 %v1698_v38 }
 0x418   : > { %2467 = vmatmul.msk.f32.vlgmr.msra.gmra.mxu0 %vm1518_vm15, %v1331_v20  ;;  %2475 = vmatmul.msk.f32.vlgmr.msra.gmra.mxu1 %vm1518_vm15, %v1331_v20  ;;  %v1974_v10 = vsel %vm482_vm5, %v2898_v14, %v2899_v24  ;;  %v1975_v58 = vsel %vm482_vm5, %v2899_v24, %v4441_v32 }
 0x419   : > { %2061 = vmatpush.msrb.mxu2 %v1974_v10  ;;  %2102 = vmatpush.msrb.mxu3 %v1975_v58 }
 0x41a   : > { %2491 = vmatmul.msk.f32.vlgmr.msrb.gmra.mxu2 %vm1518_vm15, %v2483_v31  ;;  %2499 = vmatmul.msk.f32.vlgmr.msrb.gmra.mxu3 %vm1518_vm15, %v2483_v31 }
 0x41d   : > { %v4270_v16 = vpop.f32.mrf.mxu2  ;;  %v2147_v53 = vpop.permute.xlu0 %2146 }
 0x41e   : > { %v4272_v6 = vpop.f32.mrf.mxu3 }
 0x420   : > { %2468 = vmatmul.msk.f32.gmra.mxu0 %vm1518_vm15, %v1332_v45  ;;  %2476 = vmatmul.msk.f32.gmra.mxu1 %vm1518_vm15, %v1332_v45 }
 0x422   : > { %2492 = vmatmul.msk.f32.gmra.mxu2 %vm1518_vm15, %v2484_v44  ;;  %2500 = vmatmul.msk.f32.gmra.mxu3 %vm1518_vm15, %v2484_v44 }
 0x425   : > { %v4274_v49 = vpop.f32.mrf.mxu2 }
 0x426   : > { %v4276_v63 = vpop.f32.mrf.mxu3 }
 0x428   : > { %2469 = vmatmul.msk.f32.gmra.mxu0 %vm1518_vm15, %v1333_v29  ;;  %2477 = vmatmul.msk.f32.gmra.mxu1 %vm1518_vm15, %v1333_v29  ;;  %v2157_v29 = vpop.permute.xlu2 %2156 }
 0x42a   : > { %2493 = vmatmul.msk.f32.gmra.mxu2 %vm1518_vm15, %v2485_v17  ;;  %2501 = vmatmul.msk.f32.gmra.mxu3 %vm1518_vm15, %v2485_v17 }
 0x42d   : > { %v4278_v46 = vpop.f32.mrf.mxu2 }
 0x42e   : > { %v4280_v25 = vpop.f32.mrf.mxu3 }
 0x430   : > { %2470 = vmatmul.msk.f32.gmra.mxu0 %vm1518_vm15, %v1334_v7  ;;  %2478 = vmatmul.msk.f32.gmra.mxu1 %vm1518_vm15, %v1334_v7 }
 0x432   : > { %2494 = vmatmul.msk.f32.gmra.mxu2 %vm1518_vm15, %v2486_v37  ;;  %2502 = vmatmul.msk.f32.gmra.mxu3 %vm1518_vm15, %v2486_v37 }
 0x438   : > { %2471 = vmatmul.msk.f32.gmra.mxu0 %vm1518_vm15, %v1335_v13  ;;  %2479 = vmatmul.msk.f32.gmra.mxu1 %vm1518_vm15, %v1335_v13 }
 0x43a   : > { %2495 = vmatmul.msk.f32.gmra.mxu2 %vm1518_vm15, %v2487_v47  ;;  %2503 = vmatmul.msk.f32.gmra.mxu3 %vm1518_vm15, %v2487_v47 }
 0x440   : > { %2472 = vmatmul.msk.f32.gmra.mxu0 %vm1518_vm15, %v1336_v40  ;;  %2480 = vmatmul.msk.f32.gmra.mxu1 %vm1518_vm15, %v1336_v40 }
 0x442   : > { %2496 = vmatmul.msk.f32.gmra.mxu2 %vm1518_vm15, %v2488_v48  ;;  %2504 = vmatmul.msk.f32.gmra.mxu3 %vm1518_vm15, %v2488_v48 }
 0x448   : > { %2473 = vmatmul.msk.f32.gmra.mxu0 %vm1518_vm15, %v1337_v2  ;;  %2481 = vmatmul.msk.f32.gmra.mxu1 %vm1518_vm15, %v1337_v2 }
 0x44a   : > { %2497 = vmatmul.msk.f32.gmra.mxu2 %vm1518_vm15, %v2489_v0  ;;  %2505 = vmatmul.msk.f32.gmra.mxu3 %vm1518_vm15, %v2489_v0 }
 0x450   : > { %2474 = vmatmul.msk.f32.gmra.mxu0 %vm1518_vm15, %v1338_v52  ;;  %2482 = vmatmul.msk.f32.gmra.mxu1 %vm1518_vm15, %v1338_v52 }
 0x452   : > { %2498 = vmatmul.msk.f32.gmra.mxu2 %vm1518_vm15, %v2490_v62  ;;  %2506 = vmatmul.msk.f32.gmra.mxu3 %vm1518_vm15, %v2490_v62  ;;  %v2162_v62 = vpop.permute.xlu0 %2161 }
 0x454   : > { %v4282_v59 = vpop.f32.mrf.mxu2  ;;  %v4284_v36 = vpop.f32.mrf.mxu3 }
 0x495   : > { %v1786_v1 = vpop.f32.mrf.mxu0  ;;  %v1827_v32 = vpop.f32.mrf.mxu1 }
 0x496   : > { %v1787_v55 = vadd.f32 %v1786_v1, %v1560_v23  ;;  %v1828_v57 = vadd.f32 %v1827_v32, %v1601_v54 }
 0x49d   : > { %v1789_v3 = vpop.f32.mrf.mxu0  ;;  %v1830_v26 = vpop.f32.mrf.mxu1 }
 0x49e   : > { %v2063_v18 = vpop.f32.mrf.mxu2  ;;  %v2104_v39 = vpop.f32.mrf.mxu3  ;;  %v1790_v19 = vadd.f32 %v1789_v3, %v1563_v43  ;;  %v1831_v27 = vadd.f32 %v1830_v26, %v1604_v51 }
 0x49f   : > { %v2128_v60 = vadd.f32 %v2063_v18, %v1787_v55  ;;  %v2129_v28 = vadd.f32 %v2104_v39, %v1828_v57  ;;  %v2167_v18 = vpop.permute.xlu1 %2166 }
 0x4a1   : > { %v2184_v9 = vadd.f32 %v2147_v53, %v2128_v60  ;;  %v2185_v42 = vadd.f32 %v2147_v53, %v2129_v28 }
 0x4a3   : > { %v2200_v61 = vmax.f32 %v2184_v9, 0.0  ;;  %v2201_v34 = vmax.f32 %v2185_v42, 0.0 }
 0x4a5   : > { %2216 = vst [vmem:[%s4289_s23] sm:$0xff] %v2200_v61  ;;  %v1792_v11 = vpop.f32.mrf.mxu0  ;;  %v1833_v56 = vpop.f32.mrf.mxu1 }
 0x4a6   : > { %2217 = vst [vmem:[%s4289_s23 + $0x8] sm:$0xff] %v2201_v34  ;;  %v2066_v22 = vpop.f32.mrf.mxu2  ;;  %v2107_v33 = vpop.f32.mrf.mxu3  ;;  %v1793_v14 = vadd.f32 %v1792_v11, %v1566_v15  ;;  %v1834_v41 = vadd.f32 %v1833_v56, %v1607_v21 }
 0x4a7   : > { %v2130_v35 = vadd.f32 %v2066_v22, %v1790_v19  ;;  %v2131_v8 = vadd.f32 %v2107_v33, %v1831_v27  ;;  %v2172_v61 = vpop.permute.xlu2 %2171 }
 0x4a9   : > { %v2186_v12 = vadd.f32 %v2152_v5, %v2130_v35  ;;  %v2187_v50 = vadd.f32 %v2152_v5, %v2131_v8 }
 0x4ab   : > { %v2202_v20 = vmax.f32 %v2186_v12, 0.0  ;;  %v2203_v24 = vmax.f32 %v2187_v50, 0.0 }
 0x4ad   : > { %2218 = vst [vmem:[%s4289_s23 + $0x10] sm:$0xff] %v2202_v20  ;;  %v1795_v38 = vpop.f32.mrf.mxu0  ;;  %v1836_v31 = vpop.f32.mrf.mxu1 }
 0x4ae   : > { %2219 = vst [vmem:[%s4289_s23 + $0x18] sm:$0xff] %v2203_v24  ;;  %v2069_v10 = vpop.f32.mrf.mxu2  ;;  %v2110_v58 = vpop.f32.mrf.mxu3  ;;  %v1796_v47 = vadd.f32 %v1795_v38, %v1569_v30  ;;  %v1837_v40 = vadd.f32 %v1836_v31, %v1610_v4 }
 0x4af   : > { %v2132_v45 = vadd.f32 %v2069_v10, %v1793_v14  ;;  %v2133_v44 = vadd.f32 %v2110_v58, %v1834_v41  ;;  %v2177_v20 = vpop.permute.xlu0 %2176 }
 0x4b1   : > { %v2188_v17 = vadd.f32 %v2157_v29, %v2132_v45  ;;  %v2189_v7 = vadd.f32 %v2157_v29, %v2133_v44 }
 0x4b3   : > { %v2204_v37 = vmax.f32 %v2188_v17, 0.0  ;;  %v2205_v13 = vmax.f32 %v2189_v7, 0.0  ;;  %v2182_v17 = vpop.permute.xlu1 %2181 }
 0x4b5   : > { %2220 = vst [vmem:[%s4289_s23 + $0x20] sm:$0xff] %v2204_v37  ;;  %v1798_v48 = vpop.f32.mrf.mxu0  ;;  %v1839_v2 = vpop.f32.mrf.mxu1 }
 0x4b6   : > { %2221 = vst [vmem:[%s4289_s23 + $0x28] sm:$0xff] %v2205_v13  ;;  %v2072_v0 = vpop.f32.mrf.mxu2  ;;  %v2113_v52 = vpop.f32.mrf.mxu3  ;;  %v1799_v1 = vadd.f32 %v1798_v48, %v4270_v16  ;;  %v1840_v30 = vadd.f32 %v1839_v2, %v4272_v6 }
 0x4b7   : > { %v2134_v23 = vadd.f32 %v2072_v0, %v1796_v47  ;;  %v2135_v54 = vadd.f32 %v2113_v52, %v1837_v40 }
 0x4b9   : > { %v2190_v43 = vadd.f32 %v2162_v62, %v2134_v23  ;;  %v2191_v51 = vadd.f32 %v2162_v62, %v2135_v54 }
 0x4bb   : > { %v2206_v15 = vmax.f32 %v2190_v43, 0.0  ;;  %v2207_v21 = vmax.f32 %v2191_v51, 0.0 }
 0x4bd   : > { %2222 = vst [vmem:[%s4289_s23 + $0x30] sm:$0xff] %v2206_v15  ;;  %v1801_v4 = vpop.f32.mrf.mxu0  ;;  %v1842_v32 = vpop.f32.mrf.mxu1 }
 0x4be   : > { %2223 = vst [vmem:[%s4289_s23 + $0x38] sm:$0xff] %v2207_v21  ;;  %v2075_v55 = vpop.f32.mrf.mxu2  ;;  %v2116_v57 = vpop.f32.mrf.mxu3  ;;  %v1802_v9 = vadd.f32 %v1801_v4, %v4274_v49  ;;  %v1843_v16 = vadd.f32 %v1842_v32, %v4276_v63 }
 0x4bf   : > { %v2136_v3 = vadd.f32 %v2075_v55, %v1799_v1  ;;  %v2137_v26 = vadd.f32 %v2116_v57, %v1840_v30 }
 0x4c1   : > { %v2192_v39 = vadd.f32 %v2167_v18, %v2136_v3  ;;  %v2193_v60 = vadd.f32 %v2167_v18, %v2137_v26 }
 0x4c3   : > { %v2208_v28 = vmax.f32 %v2192_v39, 0.0  ;;  %v2209_v53 = vmax.f32 %v2193_v60, 0.0 }
 0x4c5   : > { %2224 = vst [vmem:[%s4289_s23 + $0x40] sm:$0xff] %v2208_v28  ;;  %v1804_v27 = vpop.f32.mrf.mxu0  ;;  %v1845_v11 = vpop.f32.mrf.mxu1 }
 0x4c6   : > { %2225 = vst [vmem:[%s4289_s23 + $0x48] sm:$0xff] %v2209_v53  ;;  %v2078_v6 = vpop.f32.mrf.mxu2  ;;  %v2119_v42 = vpop.f32.mrf.mxu3  ;;  %v1805_v49 = vadd.f32 %v1804_v27, %v4278_v46  ;;  %v1846_v63 = vadd.f32 %v1845_v11, %v4280_v25 }
 0x4c7   : > { %v2138_v34 = vadd.f32 %v2078_v6, %v1802_v9  ;;  %v2139_v19 = vadd.f32 %v2119_v42, %v1843_v16 }
 0x4c9   : > { %v2194_v56 = vadd.f32 %v2172_v61, %v2138_v34  ;;  %v2195_v22 = vadd.f32 %v2172_v61, %v2139_v19 }
 0x4cb   : > { %v2210_v33 = vmax.f32 %v2194_v56, 0.0  ;;  %v2211_v35 = vmax.f32 %v2195_v22, 0.0 }
 0x4cd   : > { %2226 = vst [vmem:[%s4289_s23 + $0x50] sm:$0xff] %v2210_v33  ;;  %v1807_v41 = vpop.f32.mrf.mxu0  ;;  %v1848_v38 = vpop.f32.mrf.mxu1 }
 0x4ce   : > { %2227 = vst [vmem:[%s4289_s23 + $0x58] sm:$0xff] %v2211_v35  ;;  %v2081_v8 = vpop.f32.mrf.mxu2  ;;  %v2122_v5 = vpop.f32.mrf.mxu3  ;;  %v1808_v46 = vadd.f32 %v1807_v41, %v4282_v59  ;;  %v1849_v25 = vadd.f32 %v1848_v38, %v4284_v36 }
 0x4cf   : > { %v2140_v12 = vadd.f32 %v2081_v8, %v1805_v49  ;;  %v2141_v50 = vadd.f32 %v2122_v5, %v1846_v63 }
 0x4d1   : > { %v2196_v24 = vadd.f32 %v2177_v20, %v2140_v12  ;;  %v2197_v14 = vadd.f32 %v2177_v20, %v2141_v50 }
 0x4d3   : > { %v2212_v31 = vmax.f32 %v2196_v24, 0.0  ;;  %v2213_v10 = vmax.f32 %v2197_v14, 0.0 }
 0x4d5   : > { %2228 = vst [vmem:[%s4289_s23 + $0x60] sm:$0xff] %v2212_v31 }
 0x4d6   : > { %2229 = vst [vmem:[%s4289_s23 + $0x68] sm:$0xff] %v2213_v10  ;;  %v2084_v58 = vpop.f32.mrf.mxu2  ;;  %v2125_v45 = vpop.f32.mrf.mxu3 }
 0x4d7   : > { %v2142_v44 = vadd.f32 %v2084_v58, %v1808_v46  ;;  %v2143_v29 = vadd.f32 %v2125_v45, %v1849_v25 }
 0x4d9   : > { %v2198_v7 = vadd.f32 %v2182_v17, %v2142_v44  ;;  %v2199_v59 = vadd.f32 %v2182_v17, %v2143_v29 }
 0x4db   : > { %v2214_v36 = vmax.f32 %v2198_v7, 0.0  ;;  %v2215_v37 = vmax.f32 %v2199_v59, 0.0 }
 0x4dd   : > { %2230 = vst [vmem:[%s4289_s23 + $0x70] sm:$0xff] %v2214_v36 }
 0x4de   : > { %2231 = vst [vmem:[%s4289_s23 + $0x78] sm:$0xff] %v2215_v37 }
 0x4df   : > { %2937 = shalt.err (!%p2934_p3)
}
 0x4e0   : > { %s2985_s15 = smov 256  }
 0x4e1   : > { %2516 = dma.vmem_to_hbm [thread:$0]  (%p3054_p5), %s2246_s22, 2048, %s2248_s10, %s2233_s6, %s2985_s15, %s2985_s15, %s2977_s12  }
 0x4e2 PF: > { %p2522_p4 = scmp.ge.s32.totalorder %s2972_s21, 2  ;;  %s2262_s23 = sand.u32 1, %s2960_s18  }
 0x4e3   : > { %s2263_s25 = scalar_lea.sflag [#allocation3], %s2262_s23 }
 0x4e4   : > { %p2519_p7 = pnand %p2522_p4, %p3058_p6 }
 0x4e6   : > { %p2520_p8 = pneg %p2519_p7 }
 0x4e8   : > { %2955 = dma.done.wait (%p2520_p8), %s2263_s25, 2048  }
 0x4e9   : > { %2957 = vsyncadd (%p2520_p8), %s2263_s25, 4294965248  ;;  %p15_p9 = scmp.ge.s32.totalorder %s3041_s24, 4   ;;  %s4443_s18 = smov %s2964_s19 }
 0x4ea   : > { %s4444_s19 = smov %s2968_s20  ;;  %s4445_s20 = smov %s3052_s27 }
 0x4eb   : > { %s4446_s21 = smov %s3041_s24  ;;  %17 = sbr.rel (!%p15_p9) target bundleno = 3 (0x3), region = 85 }
 0x4f0   :  { %2269 = vsyncpa [#allocation3], 1 }
 0x4f1   :  { %2271 = vsyncpa [#allocation3 + $0x1], 1 }

</bundles_post_ra>
